<compile_context>
chip_gen: v7x
topology: tpu7x:2x2x1
jax: 0.10.0
libtpu: 0.0.40
codegen_flags: <defaults>
</compile_context>

<pallas_src>
import jax
import jax.numpy as jnp
from jax import lax
from jax.experimental import pallas as pl
from jax.experimental.pallas import tpu as pltpu


def fce_kernel(f_ref, g_ref, wihf_ref, wihr_ref, whh_ref, b_ref, out_ref):
    f = f_ref[...].astype(jnp.float32)            # (N, D)
    G = g_ref[...].astype(jnp.float32)            # (K, D)
    wih_f = wihf_ref[...].astype(jnp.float32)     # (D, 4D)  acts on the f half of cat(f, r)
    wih_r = wihr_ref[...].astype(jnp.float32)     # (D, 4D)  acts on the r half of cat(f, r)
    whh_T = whh_ref[...].astype(jnp.float32)      # (D, 4D)  recurrent weights (transposed)
    b = b_ref[...].astype(jnp.float32)            # (1, 4D)  = (b_ih + b_hh), gate-permuted

    N, D = f.shape
    K = G.shape[0]
    D3 = 3 * D

    # Loop-invariant gate term (f @ Wih_f + bias) and the activation-select
    # lane mask — both hoisted out of the recurrence.
    gates_fb = jnp.dot(f, wih_f, preferred_element_type=jnp.float32) + b   # (N, 4D)
    lane = lax.broadcasted_iota(jnp.int32, (N, 4 * D), 1)
    sig_mask = lane < D3          # lanes [0,3D): sigmoid (i|f|o), [3D,4D): tanh (g)

    h0 = f
    c0 = jnp.zeros_like(f)

    def step(_, carry):
        h, c = carry

        # Recurrent matmul depends only on the carry h -> issued first so its
        # MXU push/drain overlaps the whole attention sub-chain below.
        gates_h = jnp.dot(h, whh_T, preferred_element_type=jnp.float32)    # (N, 4D)

        # Attention logits over the K support rows: h @ G^T via a transposed
        # contraction (no materialized G_T, no per-step XLU transpose).
        logit = lax.dot_general(h, G, (((1,), (1,)), ((), ())),
                                preferred_element_type=jnp.float32)        # (N, K)
        m = jnp.max(logit, axis=1, keepdims=True)
        e = jnp.exp(logit - m)
        # Exact per-row normalizer; deferred past both readout matmuls (per-row
        # scalar commutes with the row-wise matmuls), so the reduce + divide
        # hide under the MXU drains.
        inv_sum = 1.0 / jnp.sum(e, axis=1, keepdims=True)                  # (N, 1)

        r_un = jnp.dot(e, G, preferred_element_type=jnp.float32)           # (N, D)
        gates_r = jnp.dot(r_un, wih_r, preferred_element_type=jnp.float32) # (N, 4D)

        # gates = f@Wih_f + b + h@Whh^T + (softmax(h G^T) @ G) @ Wih_r
        gates = gates_fb + gates_h + inv_sum * gates_r                     # (N, 4D)

        # Gate order is [i, f, o, g] (permuted in the wrapper): one fused
        # full-vreg activation pass, then slice the four gates.
        act = jnp.where(sig_mask, jax.nn.sigmoid(gates), jnp.tanh(gates))
        i_g = act[:, 0 * D:1 * D]
        f_g = act[:, 1 * D:2 * D]
        o_g = act[:, 2 * D:D3]
        g_g = act[:, D3:]

        c_new = f_g * c + i_g * g_g
        h_new = o_g * jnp.tanh(c_new) + f        # residual: h = h + f
        return (h_new, c_new)

    # K is static (G.shape[0]); unroll so the scheduler sees the whole chain.
    h, _ = lax.fori_loop(0, K, step, (h0, c0), unroll=True)
    out_ref[...] = h.astype(out_ref.dtype)


@jax.jit
def fully_contextual_embedding(f, G, w_ih, w_hh, b_ih, b_hh):
    """f: (N, D), G: (K, D); PyTorch-layout LSTMCell params."""
    N, D = f.shape

    # Gate-column permutation: PyTorch [i, f, g, o] -> kernel [i, f, o, g]
    # so activations are one contiguous sigmoid block followed by a tanh block.
    perm = jnp.concatenate([jnp.arange(0, 2 * D),
                            jnp.arange(3 * D, 4 * D),
                            jnp.arange(2 * D, 3 * D)])

    wih_T = w_ih.T[:, perm]                      # (2D, 4D), gate-permuted
    whh_T = w_hh.T[:, perm]                      # (D, 4D),  gate-permuted
    wih_f = wih_T[:D]                            # (D, 4D)  -> acts on f
    wih_r = wih_T[D:]                            # (D, 4D)  -> acts on r
    b = (b_ih + b_hh)[perm].reshape(1, 4 * D).astype(jnp.float32)

    vmem = pl.BlockSpec(memory_space=pltpu.MemorySpace.VMEM)
    return pl.pallas_call(
        fce_kernel,
        out_shape=jax.ShapeDtypeStruct((N, D), f.dtype),
        in_specs=[vmem] * 6,
        out_specs=vmem,
    )(f, G, wih_f, wih_r, whh_T, b)


def _reference(f, G, w_ih, w_hh, b_ih, b_hh):
    """Pure-JAX reference mirroring the PyTorch forward (PyTorch gate order)."""
    D = f.shape[1]
    h = f
    c = jnp.zeros_like(f)
    b = b_ih + b_hh
    for _ in range(G.shape[0]):
        logit = h @ G.T
        a = jax.nn.softmax(logit, axis=1)
        r = a @ G
        x = jnp.concatenate([f, r], axis=1)
        gates = x @ w_ih.T + h @ w_hh.T + b
        i_g = jax.nn.sigmoid(gates[:, 0 * D:1 * D])
        f_g = jax.nn.sigmoid(gates[:, 1 * D:2 * D])
        g_g = jnp.tanh(gates[:, 2 * D:3 * D])
        o_g = jax.nn.sigmoid(gates[:, 3 * D:4 * D])
        c = f_g * c + i_g * g_g
        h = o_g * jnp.tanh(c) + f
    return h


if __name__ == "__main__":
    feat_dim = 32   # D
    N = 8           # batch of query features f
    K = 8           # number of support features (rows of G)

    key = jax.random.PRNGKey(0)
    kf, kg, k1, k2, k3, k4 = jax.random.split(key, 6)

    f = jax.random.normal(kf, (N, feat_dim), dtype=jnp.float32)
    G = jax.random.normal(kg, (K, feat_dim), dtype=jnp.float32)

    # Deterministic LSTMCell params (PyTorch shapes), uniform(-1/sqrt(D), 1/sqrt(D)).
    bound = 1.0 / (feat_dim ** 0.5)
    w_ih = jax.random.uniform(k1, (4 * feat_dim, 2 * feat_dim),
                              minval=-bound, maxval=bound, dtype=jnp.float32)
    w_hh = jax.random.uniform(k2, (4 * feat_dim, feat_dim),
                              minval=-bound, maxval=bound, dtype=jnp.float32)
    b_ih = jax.random.uniform(k3, (4 * feat_dim,),
                              minval=-bound, maxval=bound, dtype=jnp.float32)
    b_hh = jax.random.uniform(k4, (4 * feat_dim,),
                              minval=-bound, maxval=bound, dtype=jnp.float32)

    out = fully_contextual_embedding(f, G, w_ih, w_hh, b_ih, b_hh)
    out = jax.block_until_ready(out)

    ref = _reference(f, G, w_ih, w_hh, b_ih, b_hh)
    # Exact-division softmax: remaining deviation is only f32 / matmul-precision
    # reassociation across the 8 recurrent steps (typically ~1e-6).
    assert jnp.allclose(out, ref, atol=1e-3, rtol=1e-3), "mismatch vs reference"

    print("KERNEL_OK")
</pallas_src>

<mosaic_0001>
module attributes {stable_mosaic.version = 11 : i64} {
  func.func @fce_kernel(%arg0: memref<8x32xf32, #tpu.memory_space<vmem>>, %arg1: memref<8x32xf32, #tpu.memory_space<vmem>>, %arg2: memref<32x128xf32, #tpu.memory_space<vmem>>, %arg3: memref<32x128xf32, #tpu.memory_space<vmem>>, %arg4: memref<32x128xf32, #tpu.memory_space<vmem>>, %arg5: memref<1x128xf32, #tpu.memory_space<vmem>>, %arg6: memref<8x32xf32, #tpu.memory_space<vmem>>) attributes {dimension_semantics = [], scalar_prefetch = 0 : i64, scratch_operands = 0 : i64, tpu.core_type = #tpu.core_type<tc>} {
    %c0 = arith.constant 0 : index
    %c0_0 = arith.constant 0 : index
    %0 = vector.load %arg0[%c0, %c0_0] : memref<8x32xf32, #tpu.memory_space<vmem>>, vector<8x32xf32>
    %c0_1 = arith.constant 0 : index
    %c0_2 = arith.constant 0 : index
    %1 = vector.load %arg1[%c0_1, %c0_2] : memref<8x32xf32, #tpu.memory_space<vmem>>, vector<8x32xf32>
    %c0_3 = arith.constant 0 : index
    %c0_4 = arith.constant 0 : index
    %2 = vector.load %arg2[%c0_3, %c0_4] : memref<32x128xf32, #tpu.memory_space<vmem>>, vector<32x128xf32>
    %c0_5 = arith.constant 0 : index
    %c0_6 = arith.constant 0 : index
    %3 = vector.load %arg3[%c0_5, %c0_6] : memref<32x128xf32, #tpu.memory_space<vmem>>, vector<32x128xf32>
    %c0_7 = arith.constant 0 : index
    %c0_8 = arith.constant 0 : index
    %4 = vector.load %arg4[%c0_7, %c0_8] : memref<32x128xf32, #tpu.memory_space<vmem>>, vector<32x128xf32>
    %c0_9 = arith.constant 0 : index
    %c0_10 = arith.constant 0 : index
    %5 = vector.load %arg5[%c0_9, %c0_10] : memref<1x128xf32, #tpu.memory_space<vmem>>, vector<1x128xf32>
    %cst = arith.constant dense<0.000000e+00> : vector<8x128xf32>
    %6 = tpu.matmul %0, %2, %cst {dimension_numbers = #tpu.dot_dimension_numbers<[1], [0], [0], [1], [0, 0, 1, 1], [], []>} : vector<8x32xf32>, vector<32x128xf32>, vector<8x128xf32> -> vector<8x128xf32>
    %7 = vector.broadcast %5 : vector<1x128xf32> to vector<8x128xf32>
    %8 = arith.addf %6, %7 : vector<8x128xf32>
    %9 = tpu.iota {dimensions = array<i32: 1>} : vector<8x128xi32>
    %c96_i32 = arith.constant 96 : i32
    %10 = vector.broadcast %c96_i32 : i32 to vector<8x128xi32>
    %11 = arith.cmpi slt, %9, %10 : vector<8x128xi32>
    %cst_11 = arith.constant 0.000000e+00 : f32
    %12 = vector.broadcast %cst_11 : f32 to vector<8x32xf32>
    %c0_i32 = arith.constant 0 : i32
    %cst_12 = arith.constant dense<0.000000e+00> : vector<8x128xf32>
    %13 = tpu.matmul %0, %4, %cst_12 {dimension_numbers = #tpu.dot_dimension_numbers<[1], [0], [0], [1], [0, 0, 1, 1], [], []>} : vector<8x32xf32>, vector<32x128xf32>, vector<8x128xf32> -> vector<8x128xf32>
    %cst_13 = arith.constant dense<0.000000e+00> : vector<8x8xf32>
    %14 = tpu.matmul %0, %1, %cst_13 {dimension_numbers = #tpu.dot_dimension_numbers<[1], [1], [0], [0], [0, 0, 1, 0], [], []>} : vector<8x32xf32>, vector<8x32xf32>, vector<8x8xf32> -> vector<8x8xf32>
    %cst_14 = arith.constant dense<0xFF800000> : vector<8xf32>
    %15 = vector.multi_reduction <maximumf>, %14, %cst_14 [1] : vector<8x8xf32> to vector<8xf32>
    %16 = vector.shape_cast %15 : vector<8xf32> to vector<8x1xf32>
    %17 = vector.broadcast %16 : vector<8x1xf32> to vector<8x8xf32>
    %18 = arith.subf %14, %17 : vector<8x8xf32>
    %19 = math.exp %18 : vector<8x8xf32>
    %cst_15 = arith.constant dense<0.000000e+00> : vector<8xf32>
    %20 = vector.multi_reduction <add>, %19, %cst_15 [1] : vector<8x8xf32> to vector<8xf32>
    %21 = vector.shape_cast %20 : vector<8xf32> to vector<8x1xf32>
    %cst_16 = arith.constant 1.000000e+00 : f32
    %22 = vector.broadcast %cst_16 : f32 to vector<8x1xf32>
    %23 = arith.divf %22, %21 : vector<8x1xf32>
    %cst_17 = arith.constant dense<0.000000e+00> : vector<8x32xf32>
    %24 = tpu.matmul %19, %1, %cst_17 {dimension_numbers = #tpu.dot_dimension_numbers<[1], [0], [0], [1], [0, 0, 1, 1], [], []>} : vector<8x8xf32>, vector<8x32xf32>, vector<8x32xf32> -> vector<8x32xf32>
    %cst_18 = arith.constant dense<0.000000e+00> : vector<8x128xf32>
    %25 = tpu.matmul %24, %3, %cst_18 {dimension_numbers = #tpu.dot_dimension_numbers<[1], [0], [0], [1], [0, 0, 1, 1], [], []>} : vector<8x32xf32>, vector<32x128xf32>, vector<8x128xf32> -> vector<8x128xf32>
    %26 = arith.addf %8, %13 : vector<8x128xf32>
    %27 = vector.broadcast %23 : vector<8x1xf32> to vector<8x128xf32>
    %28 = arith.mulf %27, %25 : vector<8x128xf32>
    %29 = arith.addf %26, %28 : vector<8x128xf32>
    %30 = arith.negf %29 : vector<8x128xf32>
    %31 = math.exp %30 : vector<8x128xf32>
    %cst_19 = arith.constant 1.000000e+00 : f32
    %32 = vector.broadcast %cst_19 : f32 to vector<8x128xf32>
    %33 = arith.addf %32, %31 : vector<8x128xf32>
    %34 = arith.divf %32, %33 : vector<8x128xf32>
    %35 = math.tanh %29 : vector<8x128xf32>
    %36 = arith.select %11, %34, %35 : vector<8x128xi1>, vector<8x128xf32>
    %37 = vector.extract_strided_slice %36 {offsets = [0, 0], sizes = [8, 32], strides = [1, 1]} : vector<8x128xf32> to vector<8x32xf32>
    %38 = vector.extract_strided_slice %36 {offsets = [0, 32], sizes = [8, 32], strides = [1, 1]} : vector<8x128xf32> to vector<8x32xf32>
    %39 = vector.extract_strided_slice %36 {offsets = [0, 64], sizes = [8, 32], strides = [1, 1]} : vector<8x128xf32> to vector<8x32xf32>
    %40 = vector.extract_strided_slice %36 {offsets = [0, 96], sizes = [8, 32], strides = [1, 1]} : vector<8x128xf32> to vector<8x32xf32>
    %41 = arith.mulf %38, %12 : vector<8x32xf32>
    %42 = arith.mulf %37, %40 : vector<8x32xf32>
    %43 = arith.addf %41, %42 : vector<8x32xf32>
    %44 = math.tanh %43 : vector<8x32xf32>
    %45 = arith.mulf %39, %44 : vector<8x32xf32>
    %46 = arith.addf %45, %0 : vector<8x32xf32>
    %c1_i32 = arith.constant 1 : i32
    %cst_20 = arith.constant dense<0.000000e+00> : vector<8x128xf32>
    %47 = tpu.matmul %46, %4, %cst_20 {dimension_numbers = #tpu.dot_dimension_numbers<[1], [0], [0], [1], [0, 0, 1, 1], [], []>} : vector<8x32xf32>, vector<32x128xf32>, vector<8x128xf32> -> vector<8x128xf32>
    %cst_21 = arith.constant dense<0.000000e+00> : vector<8x8xf32>
    %48 = tpu.matmul %46, %1, %cst_21 {dimension_numbers = #tpu.dot_dimension_numbers<[1], [1], [0], [0], [0, 0, 1, 0], [], []>} : vector<8x32xf32>, vector<8x32xf32>, vector<8x8xf32> -> vector<8x8xf32>
    %cst_22 = arith.constant dense<0xFF800000> : vector<8xf32>
    %49 = vector.multi_reduction <maximumf>, %48, %cst_22 [1] : vector<8x8xf32> to vector<8xf32>
    %50 = vector.shape_cast %49 : vector<8xf32> to vector<8x1xf32>
    %51 = vector.broadcast %50 : vector<8x1xf32> to vector<8x8xf32>
    %52 = arith.subf %48, %51 : vector<8x8xf32>
    %53 = math.exp %52 : vector<8x8xf32>
    %cst_23 = arith.constant dense<0.000000e+00> : vector<8xf32>
    %54 = vector.multi_reduction <add>, %53, %cst_23 [1] : vector<8x8xf32> to vector<8xf32>
    %55 = vector.shape_cast %54 : vector<8xf32> to vector<8x1xf32>
    %cst_24 = arith.constant 1.000000e+00 : f32
    %56 = vector.broadcast %cst_24 : f32 to vector<8x1xf32>
    %57 = arith.divf %56, %55 : vector<8x1xf32>
    %cst_25 = arith.constant dense<0.000000e+00> : vector<8x32xf32>
    %58 = tpu.matmul %53, %1, %cst_25 {dimension_numbers = #tpu.dot_dimension_numbers<[1], [0], [0], [1], [0, 0, 1, 1], [], []>} : vector<8x8xf32>, vector<8x32xf32>, vector<8x32xf32> -> vector<8x32xf32>
    %cst_26 = arith.constant dense<0.000000e+00> : vector<8x128xf32>
    %59 = tpu.matmul %58, %3, %cst_26 {dimension_numbers = #tpu.dot_dimension_numbers<[1], [0], [0], [1], [0, 0, 1, 1], [], []>} : vector<8x32xf32>, vector<32x128xf32>, vector<8x128xf32> -> vector<8x128xf32>
    %60 = arith.addf %8, %47 : vector<8x128xf32>
    %61 = vector.broadcast %57 : vector<8x1xf32> to vector<8x128xf32>
    %62 = arith.mulf %61, %59 : vector<8x128xf32>
    %63 = arith.addf %60, %62 : vector<8x128xf32>
    %64 = arith.negf %63 : vector<8x128xf32>
    %65 = math.exp %64 : vector<8x128xf32>
    %cst_27 = arith.constant 1.000000e+00 : f32
    %66 = vector.broadcast %cst_27 : f32 to vector<8x128xf32>
    %67 = arith.addf %66, %65 : vector<8x128xf32>
    %68 = arith.divf %66, %67 : vector<8x128xf32>
    %69 = math.tanh %63 : vector<8x128xf32>
    %70 = arith.select %11, %68, %69 : vector<8x128xi1>, vector<8x128xf32>
    %71 = vector.extract_strided_slice %70 {offsets = [0, 0], sizes = [8, 32], strides = [1, 1]} : vector<8x128xf32> to vector<8x32xf32>
    %72 = vector.extract_strided_slice %70 {offsets = [0, 32], sizes = [8, 32], strides = [1, 1]} : vector<8x128xf32> to vector<8x32xf32>
    %73 = vector.extract_strided_slice %70 {offsets = [0, 64], sizes = [8, 32], strides = [1, 1]} : vector<8x128xf32> to vector<8x32xf32>
    %74 = vector.extract_strided_slice %70 {offsets = [0, 96], sizes = [8, 32], strides = [1, 1]} : vector<8x128xf32> to vector<8x32xf32>
    %75 = arith.mulf %72, %43 : vector<8x32xf32>
    %76 = arith.mulf %71, %74 : vector<8x32xf32>
    %77 = arith.addf %75, %76 : vector<8x32xf32>
    %78 = math.tanh %77 : vector<8x32xf32>
    %79 = arith.mulf %73, %78 : vector<8x32xf32>
    %80 = arith.addf %79, %0 : vector<8x32xf32>
    %c2_i32 = arith.constant 2 : i32
    %cst_28 = arith.constant dense<0.000000e+00> : vector<8x128xf32>
    %81 = tpu.matmul %80, %4, %cst_28 {dimension_numbers = #tpu.dot_dimension_numbers<[1], [0], [0], [1], [0, 0, 1, 1], [], []>} : vector<8x32xf32>, vector<32x128xf32>, vector<8x128xf32> -> vector<8x128xf32>
    %cst_29 = arith.constant dense<0.000000e+00> : vector<8x8xf32>
    %82 = tpu.matmul %80, %1, %cst_29 {dimension_numbers = #tpu.dot_dimension_numbers<[1], [1], [0], [0], [0, 0, 1, 0], [], []>} : vector<8x32xf32>, vector<8x32xf32>, vector<8x8xf32> -> vector<8x8xf32>
    %cst_30 = arith.constant dense<0xFF800000> : vector<8xf32>
    %83 = vector.multi_reduction <maximumf>, %82, %cst_30 [1] : vector<8x8xf32> to vector<8xf32>
    %84 = vector.shape_cast %83 : vector<8xf32> to vector<8x1xf32>
    %85 = vector.broadcast %84 : vector<8x1xf32> to vector<8x8xf32>
    %86 = arith.subf %82, %85 : vector<8x8xf32>
    %87 = math.exp %86 : vector<8x8xf32>
    %cst_31 = arith.constant dense<0.000000e+00> : vector<8xf32>
    %88 = vector.multi_reduction <add>, %87, %cst_31 [1] : vector<8x8xf32> to vector<8xf32>
    %89 = vector.shape_cast %88 : vector<8xf32> to vector<8x1xf32>
    %cst_32 = arith.constant 1.000000e+00 : f32
    %90 = vector.broadcast %cst_32 : f32 to vector<8x1xf32>
    %91 = arith.divf %90, %89 : vector<8x1xf32>
    %cst_33 = arith.constant dense<0.000000e+00> : vector<8x32xf32>
    %92 = tpu.matmul %87, %1, %cst_33 {dimension_numbers = #tpu.dot_dimension_numbers<[1], [0], [0], [1], [0, 0, 1, 1], [], []>} : vector<8x8xf32>, vector<8x32xf32>, vector<8x32xf32> -> vector<8x32xf32>
    %cst_34 = arith.constant dense<0.000000e+00> : vector<8x128xf32>
    %93 = tpu.matmul %92, %3, %cst_34 {dimension_numbers = #tpu.dot_dimension_numbers<[1], [0], [0], [1], [0, 0, 1, 1], [], []>} : vector<8x32xf32>, vector<32x128xf32>, vector<8x128xf32> -> vector<8x128xf32>
    %94 = arith.addf %8, %81 : vector<8x128xf32>
    %95 = vector.broadcast %91 : vector<8x1xf32> to vector<8x128xf32>
    %96 = arith.mulf %95, %93 : vector<8x128xf32>
    %97 = arith.addf %94, %96 : vector<8x128xf32>
    %98 = arith.negf %97 : vector<8x128xf32>
    %99 = math.exp %98 : vector<8x128xf32>
    %cst_35 = arith.constant 1.000000e+00 : f32
    %100 = vector.broadcast %cst_35 : f32 to vector<8x128xf32>
    %101 = arith.addf %100, %99 : vector<8x128xf32>
    %102 = arith.divf %100, %101 : vector<8x128xf32>
    %103 = math.tanh %97 : vector<8x128xf32>
    %104 = arith.select %11, %102, %103 : vector<8x128xi1>, vector<8x128xf32>
    %105 = vector.extract_strided_slice %104 {offsets = [0, 0], sizes = [8, 32], strides = [1, 1]} : vector<8x128xf32> to vector<8x32xf32>
    %106 = vector.extract_strided_slice %104 {offsets = [0, 32], sizes = [8, 32], strides = [1, 1]} : vector<8x128xf32> to vector<8x32xf32>
    %107 = vector.extract_strided_slice %104 {offsets = [0, 64], sizes = [8, 32], strides = [1, 1]} : vector<8x128xf32> to vector<8x32xf32>
    %108 = vector.extract_strided_slice %104 {offsets = [0, 96], sizes = [8, 32], strides = [1, 1]} : vector<8x128xf32> to vector<8x32xf32>
    %109 = arith.mulf %106, %77 : vector<8x32xf32>
    %110 = arith.mulf %105, %108 : vector<8x32xf32>
    %111 = arith.addf %109, %110 : vector<8x32xf32>
    %112 = math.tanh %111 : vector<8x32xf32>
    %113 = arith.mulf %107, %112 : vector<8x32xf32>
    %114 = arith.addf %113, %0 : vector<8x32xf32>
    %c3_i32 = arith.constant 3 : i32
    %cst_36 = arith.constant dense<0.000000e+00> : vector<8x128xf32>
    %115 = tpu.matmul %114, %4, %cst_36 {dimension_numbers = #tpu.dot_dimension_numbers<[1], [0], [0], [1], [0, 0, 1, 1], [], []>} : vector<8x32xf32>, vector<32x128xf32>, vector<8x128xf32> -> vector<8x128xf32>
    %cst_37 = arith.constant dense<0.000000e+00> : vector<8x8xf32>
    %116 = tpu.matmul %114, %1, %cst_37 {dimension_numbers = #tpu.dot_dimension_numbers<[1], [1], [0], [0], [0, 0, 1, 0], [], []>} : vector<8x32xf32>, vector<8x32xf32>, vector<8x8xf32> -> vector<8x8xf32>
    %cst_38 = arith.constant dense<0xFF800000> : vector<8xf32>
    %117 = vector.multi_reduction <maximumf>, %116, %cst_38 [1] : vector<8x8xf32> to vector<8xf32>
    %118 = vector.shape_cast %117 : vector<8xf32> to vector<8x1xf32>
    %119 = vector.broadcast %118 : vector<8x1xf32> to vector<8x8xf32>
    %120 = arith.subf %116, %119 : vector<8x8xf32>
    %121 = math.exp %120 : vector<8x8xf32>
    %cst_39 = arith.constant dense<0.000000e+00> : vector<8xf32>
    %122 = vector.multi_reduction <add>, %121, %cst_39 [1] : vector<8x8xf32> to vector<8xf32>
    %123 = vector.shape_cast %122 : vector<8xf32> to vector<8x1xf32>
    %cst_40 = arith.constant 1.000000e+00 : f32
    %124 = vector.broadcast %cst_40 : f32 to vector<8x1xf32>
    %125 = arith.divf %124, %123 : vector<8x1xf32>
    %cst_41 = arith.constant dense<0.000000e+00> : vector<8x32xf32>
    %126 = tpu.matmul %121, %1, %cst_41 {dimension_numbers = #tpu.dot_dimension_numbers<[1], [0], [0], [1], [0, 0, 1, 1], [], []>} : vector<8x8xf32>, vector<8x32xf32>, vector<8x32xf32> -> vector<8x32xf32>
    %cst_42 = arith.constant dense<0.000000e+00> : vector<8x128xf32>
    %127 = tpu.matmul %126, %3, %cst_42 {dimension_numbers = #tpu.dot_dimension_numbers<[1], [0], [0], [1], [0, 0, 1, 1], [], []>} : vector<8x32xf32>, vector<32x128xf32>, vector<8x128xf32> -> vector<8x128xf32>
    %128 = arith.addf %8, %115 : vector<8x128xf32>
    %129 = vector.broadcast %125 : vector<8x1xf32> to vector<8x128xf32>
    %130 = arith.mulf %129, %127 : vector<8x128xf32>
    %131 = arith.addf %128, %130 : vector<8x128xf32>
    %132 = arith.negf %131 : vector<8x128xf32>
    %133 = math.exp %132 : vector<8x128xf32>
    %cst_43 = arith.constant 1.000000e+00 : f32
    %134 = vector.broadcast %cst_43 : f32 to vector<8x128xf32>
    %135 = arith.addf %134, %133 : vector<8x128xf32>
    %136 = arith.divf %134, %135 : vector<8x128xf32>
    %137 = math.tanh %131 : vector<8x128xf32>
    %138 = arith.select %11, %136, %137 : vector<8x128xi1>, vector<8x128xf32>
    %139 = vector.extract_strided_slice %138 {offsets = [0, 0], sizes = [8, 32], strides = [1, 1]} : vector<8x128xf32> to vector<8x32xf32>
    %140 = vector.extract_strided_slice %138 {offsets = [0, 32], sizes = [8, 32], strides = [1, 1]} : vector<8x128xf32> to vector<8x32xf32>
    %141 = vector.extract_strided_slice %138 {offsets = [0, 64], sizes = [8, 32], strides = [1, 1]} : vector<8x128xf32> to vector<8x32xf32>
    %142 = vector.extract_strided_slice %138 {offsets = [0, 96], sizes = [8, 32], strides = [1, 1]} : vector<8x128xf32> to vector<8x32xf32>
    %143 = arith.mulf %140, %111 : vector<8x32xf32>
    %144 = arith.mulf %139, %142 : vector<8x32xf32>
    %145 = arith.addf %143, %144 : vector<8x32xf32>
    %146 = math.tanh %145 : vector<8x32xf32>
    %147 = arith.mulf %141, %146 : vector<8x32xf32>
    %148 = arith.addf %147, %0 : vector<8x32xf32>
    %c4_i32 = arith.constant 4 : i32
    %cst_44 = arith.constant dense<0.000000e+00> : vector<8x128xf32>
    %149 = tpu.matmul %148, %4, %cst_44 {dimension_numbers = #tpu.dot_dimension_numbers<[1], [0], [0], [1], [0, 0, 1, 1], [], []>} : vector<8x32xf32>, vector<32x128xf32>, vector<8x128xf32> -> vector<8x128xf32>
    %cst_45 = arith.constant dense<0.000000e+00> : vector<8x8xf32>
    %150 = tpu.matmul %148, %1, %cst_45 {dimension_numbers = #tpu.dot_dimension_numbers<[1], [1], [0], [0], [0, 0, 1, 0], [], []>} : vector<8x32xf32>, vector<8x32xf32>, vector<8x8xf32> -> vector<8x8xf32>
    %cst_46 = arith.constant dense<0xFF800000> : vector<8xf32>
    %151 = vector.multi_reduction <maximumf>, %150, %cst_46 [1] : vector<8x8xf32> to vector<8xf32>
    %152 = vector.shape_cast %151 : vector<8xf32> to vector<8x1xf32>
    %153 = vector.broadcast %152 : vector<8x1xf32> to vector<8x8xf32>
    %154 = arith.subf %150, %153 : vector<8x8xf32>
    %155 = math.exp %154 : vector<8x8xf32>
    %cst_47 = arith.constant dense<0.000000e+00> : vector<8xf32>
    %156 = vector.multi_reduction <add>, %155, %cst_47 [1] : vector<8x8xf32> to vector<8xf32>
    %157 = vector.shape_cast %156 : vector<8xf32> to vector<8x1xf32>
    %cst_48 = arith.constant 1.000000e+00 : f32
    %158 = vector.broadcast %cst_48 : f32 to vector<8x1xf32>
    %159 = arith.divf %158, %157 : vector<8x1xf32>
    %cst_49 = arith.constant dense<0.000000e+00> : vector<8x32xf32>
    %160 = tpu.matmul %155, %1, %cst_49 {dimension_numbers = #tpu.dot_dimension_numbers<[1], [0], [0], [1], [0, 0, 1, 1], [], []>} : vector<8x8xf32>, vector<8x32xf32>, vector<8x32xf32> -> vector<8x32xf32>
    %cst_50 = arith.constant dense<0.000000e+00> : vector<8x128xf32>
    %161 = tpu.matmul %160, %3, %cst_50 {dimension_numbers = #tpu.dot_dimension_numbers<[1], [0], [0], [1], [0, 0, 1, 1], [], []>} : vector<8x32xf32>, vector<32x128xf32>, vector<8x128xf32> -> vector<8x128xf32>
    %162 = arith.addf %8, %149 : vector<8x128xf32>
    %163 = vector.broadcast %159 : vector<8x1xf32> to vector<8x128xf32>
    %164 = arith.mulf %163, %161 : vector<8x128xf32>
    %165 = arith.addf %162, %164 : vector<8x128xf32>
    %166 = arith.negf %165 : vector<8x128xf32>
    %167 = math.exp %166 : vector<8x128xf32>
    %cst_51 = arith.constant 1.000000e+00 : f32
    %168 = vector.broadcast %cst_51 : f32 to vector<8x128xf32>
    %169 = arith.addf %168, %167 : vector<8x128xf32>
    %170 = arith.divf %168, %169 : vector<8x128xf32>
    %171 = math.tanh %165 : vector<8x128xf32>
    %172 = arith.select %11, %170, %171 : vector<8x128xi1>, vector<8x128xf32>
    %173 = vector.extract_strided_slice %172 {offsets = [0, 0], sizes = [8, 32], strides = [1, 1]} : vector<8x128xf32> to vector<8x32xf32>
    %174 = vector.extract_strided_slice %172 {offsets = [0, 32], sizes = [8, 32], strides = [1, 1]} : vector<8x128xf32> to vector<8x32xf32>
    %175 = vector.extract_strided_slice %172 {offsets = [0, 64], sizes = [8, 32], strides = [1, 1]} : vector<8x128xf32> to vector<8x32xf32>
    %176 = vector.extract_strided_slice %172 {offsets = [0, 96], sizes = [8, 32], strides = [1, 1]} : vector<8x128xf32> to vector<8x32xf32>
    %177 = arith.mulf %174, %145 : vector<8x32xf32>
    %178 = arith.mulf %173, %176 : vector<8x32xf32>
    %179 = arith.addf %177, %178 : vector<8x32xf32>
    %180 = math.tanh %179 : vector<8x32xf32>
    %181 = arith.mulf %175, %180 : vector<8x32xf32>
    %182 = arith.addf %181, %0 : vector<8x32xf32>
    %c5_i32 = arith.constant 5 : i32
    %cst_52 = arith.constant dense<0.000000e+00> : vector<8x128xf32>
    %183 = tpu.matmul %182, %4, %cst_52 {dimension_numbers = #tpu.dot_dimension_numbers<[1], [0], [0], [1], [0, 0, 1, 1], [], []>} : vector<8x32xf32>, vector<32x128xf32>, vector<8x128xf32> -> vector<8x128xf32>
    %cst_53 = arith.constant dense<0.000000e+00> : vector<8x8xf32>
    %184 = tpu.matmul %182, %1, %cst_53 {dimension_numbers = #tpu.dot_dimension_numbers<[1], [1], [0], [0], [0, 0, 1, 0], [], []>} : vector<8x32xf32>, vector<8x32xf32>, vector<8x8xf32> -> vector<8x8xf32>
    %cst_54 = arith.constant dense<0xFF800000> : vector<8xf32>
    %185 = vector.multi_reduction <maximumf>, %184, %cst_54 [1] : vector<8x8xf32> to vector<8xf32>
    %186 = vector.shape_cast %185 : vector<8xf32> to vector<8x1xf32>
    %187 = vector.broadcast %186 : vector<8x1xf32> to vector<8x8xf32>
    %188 = arith.subf %184, %187 : vector<8x8xf32>
    %189 = math.exp %188 : vector<8x8xf32>
    %cst_55 = arith.constant dense<0.000000e+00> : vector<8xf32>
    %190 = vector.multi_reduction <add>, %189, %cst_55 [1] : vector<8x8xf32> to vector<8xf32>
    %191 = vector.shape_cast %190 : vector<8xf32> to vector<8x1xf32>
    %cst_56 = arith.constant 1.000000e+00 : f32
    %192 = vector.broadcast %cst_56 : f32 to vector<8x1xf32>
    %193 = arith.divf %192, %191 : vector<8x1xf32>
    %cst_57 = arith.constant dense<0.000000e+00> : vector<8x32xf32>
    %194 = tpu.matmul %189, %1, %cst_57 {dimension_numbers = #tpu.dot_dimension_numbers<[1], [0], [0], [1], [0, 0, 1, 1], [], []>} : vector<8x8xf32>, vector<8x32xf32>, vector<8x32xf32> -> vector<8x32xf32>
    %cst_58 = arith.constant dense<0.000000e+00> : vector<8x128xf32>
    %195 = tpu.matmul %194, %3, %cst_58 {dimension_numbers = #tpu.dot_dimension_numbers<[1], [0], [0], [1], [0, 0, 1, 1], [], []>} : vector<8x32xf32>, vector<32x128xf32>, vector<8x128xf32> -> vector<8x128xf32>
    %196 = arith.addf %8, %183 : vector<8x128xf32>
    %197 = vector.broadcast %193 : vector<8x1xf32> to vector<8x128xf32>
    %198 = arith.mulf %197, %195 : vector<8x128xf32>
    %199 = arith.addf %196, %198 : vector<8x128xf32>
    %200 = arith.negf %199 : vector<8x128xf32>
    %201 = math.exp %200 : vector<8x128xf32>
    %cst_59 = arith.constant 1.000000e+00 : f32
    %202 = vector.broadcast %cst_59 : f32 to vector<8x128xf32>
    %203 = arith.addf %202, %201 : vector<8x128xf32>
    %204 = arith.divf %202, %203 : vector<8x128xf32>
    %205 = math.tanh %199 : vector<8x128xf32>
    %206 = arith.select %11, %204, %205 : vector<8x128xi1>, vector<8x128xf32>
    %207 = vector.extract_strided_slice %206 {offsets = [0, 0], sizes = [8, 32], strides = [1, 1]} : vector<8x128xf32> to vector<8x32xf32>
    %208 = vector.extract_strided_slice %206 {offsets = [0, 32], sizes = [8, 32], strides = [1, 1]} : vector<8x128xf32> to vector<8x32xf32>
    %209 = vector.extract_strided_slice %206 {offsets = [0, 64], sizes = [8, 32], strides = [1, 1]} : vector<8x128xf32> to vector<8x32xf32>
    %210 = vector.extract_strided_slice %206 {offsets = [0, 96], sizes = [8, 32], strides = [1, 1]} : vector<8x128xf32> to vector<8x32xf32>
    %211 = arith.mulf %208, %179 : vector<8x32xf32>
    %212 = arith.mulf %207, %210 : vector<8x32xf32>
    %213 = arith.addf %211, %212 : vector<8x32xf32>
    %214 = math.tanh %213 : vector<8x32xf32>
    %215 = arith.mulf %209, %214 : vector<8x32xf32>
    %216 = arith.addf %215, %0 : vector<8x32xf32>
    %c6_i32 = arith.constant 6 : i32
    %cst_60 = arith.constant dense<0.000000e+00> : vector<8x128xf32>
    %217 = tpu.matmul %216, %4, %cst_60 {dimension_numbers = #tpu.dot_dimension_numbers<[1], [0], [0], [1], [0, 0, 1, 1], [], []>} : vector<8x32xf32>, vector<32x128xf32>, vector<8x128xf32> -> vector<8x128xf32>
    %cst_61 = arith.constant dense<0.000000e+00> : vector<8x8xf32>
    %218 = tpu.matmul %216, %1, %cst_61 {dimension_numbers = #tpu.dot_dimension_numbers<[1], [1], [0], [0], [0, 0, 1, 0], [], []>} : vector<8x32xf32>, vector<8x32xf32>, vector<8x8xf32> -> vector<8x8xf32>
    %cst_62 = arith.constant dense<0xFF800000> : vector<8xf32>
    %219 = vector.multi_reduction <maximumf>, %218, %cst_62 [1] : vector<8x8xf32> to vector<8xf32>
    %220 = vector.shape_cast %219 : vector<8xf32> to vector<8x1xf32>
    %221 = vector.broadcast %220 : vector<8x1xf32> to vector<8x8xf32>
    %222 = arith.subf %218, %221 : vector<8x8xf32>
    %223 = math.exp %222 : vector<8x8xf32>
    %cst_63 = arith.constant dense<0.000000e+00> : vector<8xf32>
    %224 = vector.multi_reduction <add>, %223, %cst_63 [1] : vector<8x8xf32> to vector<8xf32>
    %225 = vector.shape_cast %224 : vector<8xf32> to vector<8x1xf32>
    %cst_64 = arith.constant 1.000000e+00 : f32
    %226 = vector.broadcast %cst_64 : f32 to vector<8x1xf32>
    %227 = arith.divf %226, %225 : vector<8x1xf32>
    %cst_65 = arith.constant dense<0.000000e+00> : vector<8x32xf32>
    %228 = tpu.matmul %223, %1, %cst_65 {dimension_numbers = #tpu.dot_dimension_numbers<[1], [0], [0], [1], [0, 0, 1, 1], [], []>} : vector<8x8xf32>, vector<8x32xf32>, vector<8x32xf32> -> vector<8x32xf32>
    %cst_66 = arith.constant dense<0.000000e+00> : vector<8x128xf32>
    %229 = tpu.matmul %228, %3, %cst_66 {dimension_numbers = #tpu.dot_dimension_numbers<[1], [0], [0], [1], [0, 0, 1, 1], [], []>} : vector<8x32xf32>, vector<32x128xf32>, vector<8x128xf32> -> vector<8x128xf32>
    %230 = arith.addf %8, %217 : vector<8x128xf32>
    %231 = vector.broadcast %227 : vector<8x1xf32> to vector<8x128xf32>
    %232 = arith.mulf %231, %229 : vector<8x128xf32>
    %233 = arith.addf %230, %232 : vector<8x128xf32>
    %234 = arith.negf %233 : vector<8x128xf32>
    %235 = math.exp %234 : vector<8x128xf32>
    %cst_67 = arith.constant 1.000000e+00 : f32
    %236 = vector.broadcast %cst_67 : f32 to vector<8x128xf32>
    %237 = arith.addf %236, %235 : vector<8x128xf32>
    %238 = arith.divf %236, %237 : vector<8x128xf32>
    %239 = math.tanh %233 : vector<8x128xf32>
    %240 = arith.select %11, %238, %239 : vector<8x128xi1>, vector<8x128xf32>
    %241 = vector.extract_strided_slice %240 {offsets = [0, 0], sizes = [8, 32], strides = [1, 1]} : vector<8x128xf32> to vector<8x32xf32>
    %242 = vector.extract_strided_slice %240 {offsets = [0, 32], sizes = [8, 32], strides = [1, 1]} : vector<8x128xf32> to vector<8x32xf32>
    %243 = vector.extract_strided_slice %240 {offsets = [0, 64], sizes = [8, 32], strides = [1, 1]} : vector<8x128xf32> to vector<8x32xf32>
    %244 = vector.extract_strided_slice %240 {offsets = [0, 96], sizes = [8, 32], strides = [1, 1]} : vector<8x128xf32> to vector<8x32xf32>
    %245 = arith.mulf %242, %213 : vector<8x32xf32>
    %246 = arith.mulf %241, %244 : vector<8x32xf32>
    %247 = arith.addf %245, %246 : vector<8x32xf32>
    %248 = math.tanh %247 : vector<8x32xf32>
    %249 = arith.mulf %243, %248 : vector<8x32xf32>
    %250 = arith.addf %249, %0 : vector<8x32xf32>
    %c7_i32 = arith.constant 7 : i32
    %cst_68 = arith.constant dense<0.000000e+00> : vector<8x128xf32>
    %251 = tpu.matmul %250, %4, %cst_68 {dimension_numbers = #tpu.dot_dimension_numbers<[1], [0], [0], [1], [0, 0, 1, 1], [], []>} : vector<8x32xf32>, vector<32x128xf32>, vector<8x128xf32> -> vector<8x128xf32>
    %cst_69 = arith.constant dense<0.000000e+00> : vector<8x8xf32>
    %252 = tpu.matmul %250, %1, %cst_69 {dimension_numbers = #tpu.dot_dimension_numbers<[1], [1], [0], [0], [0, 0, 1, 0], [], []>} : vector<8x32xf32>, vector<8x32xf32>, vector<8x8xf32> -> vector<8x8xf32>
    %cst_70 = arith.constant dense<0xFF800000> : vector<8xf32>
    %253 = vector.multi_reduction <maximumf>, %252, %cst_70 [1] : vector<8x8xf32> to vector<8xf32>
    %254 = vector.shape_cast %253 : vector<8xf32> to vector<8x1xf32>
    %255 = vector.broadcast %254 : vector<8x1xf32> to vector<8x8xf32>
    %256 = arith.subf %252, %255 : vector<8x8xf32>
    %257 = math.exp %256 : vector<8x8xf32>
    %cst_71 = arith.constant dense<0.000000e+00> : vector<8xf32>
    %258 = vector.multi_reduction <add>, %257, %cst_71 [1] : vector<8x8xf32> to vector<8xf32>
    %259 = vector.shape_cast %258 : vector<8xf32> to vector<8x1xf32>
    %cst_72 = arith.constant 1.000000e+00 : f32
    %260 = vector.broadcast %cst_72 : f32 to vector<8x1xf32>
    %261 = arith.divf %260, %259 : vector<8x1xf32>
    %cst_73 = arith.constant dense<0.000000e+00> : vector<8x32xf32>
    %262 = tpu.matmul %257, %1, %cst_73 {dimension_numbers = #tpu.dot_dimension_numbers<[1], [0], [0], [1], [0, 0, 1, 1], [], []>} : vector<8x8xf32>, vector<8x32xf32>, vector<8x32xf32> -> vector<8x32xf32>
    %cst_74 = arith.constant dense<0.000000e+00> : vector<8x128xf32>
    %263 = tpu.matmul %262, %3, %cst_74 {dimension_numbers = #tpu.dot_dimension_numbers<[1], [0], [0], [1], [0, 0, 1, 1], [], []>} : vector<8x32xf32>, vector<32x128xf32>, vector<8x128xf32> -> vector<8x128xf32>
    %264 = arith.addf %8, %251 : vector<8x128xf32>
    %265 = vector.broadcast %261 : vector<8x1xf32> to vector<8x128xf32>
    %266 = arith.mulf %265, %263 : vector<8x128xf32>
    %267 = arith.addf %264, %266 : vector<8x128xf32>
    %268 = arith.negf %267 : vector<8x128xf32>
    %269 = math.exp %268 : vector<8x128xf32>
    %cst_75 = arith.constant 1.000000e+00 : f32
    %270 = vector.broadcast %cst_75 : f32 to vector<8x128xf32>
    %271 = arith.addf %270, %269 : vector<8x128xf32>
    %272 = arith.divf %270, %271 : vector<8x128xf32>
    %273 = math.tanh %267 : vector<8x128xf32>
    %274 = arith.select %11, %272, %273 : vector<8x128xi1>, vector<8x128xf32>
    %275 = vector.extract_strided_slice %274 {offsets = [0, 0], sizes = [8, 32], strides = [1, 1]} : vector<8x128xf32> to vector<8x32xf32>
    %276 = vector.extract_strided_slice %274 {offsets = [0, 32], sizes = [8, 32], strides = [1, 1]} : vector<8x128xf32> to vector<8x32xf32>
    %277 = vector.extract_strided_slice %274 {offsets = [0, 64], sizes = [8, 32], strides = [1, 1]} : vector<8x128xf32> to vector<8x32xf32>
    %278 = vector.extract_strided_slice %274 {offsets = [0, 96], sizes = [8, 32], strides = [1, 1]} : vector<8x128xf32> to vector<8x32xf32>
    %279 = arith.mulf %276, %247 : vector<8x32xf32>
    %280 = arith.mulf %275, %278 : vector<8x32xf32>
    %281 = arith.addf %279, %280 : vector<8x32xf32>
    %282 = math.tanh %281 : vector<8x32xf32>
    %283 = arith.mulf %277, %282 : vector<8x32xf32>
    %284 = arith.addf %283, %0 : vector<8x32xf32>
    %c0_76 = arith.constant 0 : index
    %c0_77 = arith.constant 0 : index
    %285 = vector.load %arg6[%c0_76, %c0_77] : memref<8x32xf32, #tpu.memory_space<vmem>>, vector<8x32xf32>
    tpu.vector_store %arg6[%c0_76, %c0_77], %284 {strides = array<i32>} : memref<8x32xf32, #tpu.memory_space<vmem>>, vector<8x32xf32>,
    return
  }
}

</mosaic_0001>

<bundles_post_ra>
// kernel: fully_contextual_embedding.1
= control target key start
LH: loop header
LB: loop body
LE: loop exit
PB: predicated region body
PF: predicated region fallthrough
CT: control target
= control target key end

     0   :  { %v3453_v3 = vmov 0.0|0.0   ;;  %vm3454_vm0 = vmmov 0   ;;  %v3455_v11 = vmov 0.0   ;;  %s3885_s0 = inlined_call_operand.vmem [shape: f32[8,32], index: 0, kind: input, shape index: {}]   ;;  %s3886_s1 = inlined_call_operand.vmem [shape: f32[8,32], index: 1, kind: input, shape index: {}]   ;;  %s3887_s2 = inlined_call_operand.vmem [shape: f32[32,128], index: 2, kind: input, shape index: {}]   ;;  %s3888_s3 = inlined_call_operand.vmem [shape: f32[32,128], index: 3, kind: input, shape index: {}]   ;;  %s3889_s4 = inlined_call_operand.vmem [shape: f32[32,128], index: 4, kind: input, shape index: {}]   ;;  %s3890_s5 = inlined_call_operand.vmem [shape: f32[1,128], index: 5, kind: input, shape index: {}]   ;;  %s3891_s6 = inlined_call_operand.hbm [shape: f32[8,32], index: 6, kind: output, shape index: {}]  }
   0x1   :  { %v34_v0 = vld [vmem:[%s3889_s4] sm:$0xff]  ;;  %v35_v1 = vld [vmem:[%s3889_s4 + $0x8] sm:$0xff]  ;;  %3231 = vmatprep.subr.bf16.mxu1 %v3453_v3  ;;  %3225 = vmatprep.subr.bf16.mxu0 %v3453_v3  ;;  %v36_v6 = vld [vmem:[%s3889_s4 + $0x10] sm:$0xff] }
   0x2   :  { %v26_v2 = vld [vmem:[%s3887_s2] sm:$0xff]  ;;  %v3504_v4 = vpack.c.bf16 %v35_v1, %v34_v0  ;;  %v27_v5 = vld [vmem:[%s3887_s2 + $0x8] sm:$0xff]  ;;  %v37_v7 = vld [vmem:[%s3889_s4 + $0x18] sm:$0xff]  ;;  %2966 = vmatprep.mubr.msk.f32.mxu0 %vm3454_vm0, %v3455_v11  ;;  %2977 = vmatprep.mubr.msk.f32.mxu1 %vm3454_vm0, %v3455_v11 }
   0x3   :  { %v3226_v8 = vpack.c.bf16 %v27_v5, %v26_v2  ;;  %v28_v9 = vld [vmem:[%s3887_s2 + $0x10] sm:$0xff]  ;;  %v29_v10 = vld [vmem:[%s3887_s2 + $0x18] sm:$0xff]  ;;  %v3527_v12 = vpack.c.bf16 %v37_v7, %v36_v6 }
   0x4   :  { %3233 = vmatpush3.bf16.msra.mxu1 %v3504_v4 }
   0x5   :  { %11 = vsyncpa [#allocation3], 0  ;;  %3234 = vmatprep.subr.bf16.mxu1 %v3453_v3  ;;  %3227 = vmatpush3.bf16.msra.mxu0 %v3226_v8  ;;  %v3229_v13 = vpack.c.bf16 %v29_v10, %v28_v9  ;;  %v3535_v14 = vld [vmem:[%s3885_s0] sm:$0xff]  ;;  %vm45_vm1 = vcmask 261120   ;;  %vm265_vm2 = vcmask 64512   ;;  %v31_v29 = vld [vmem:[%s3888_s3 + $0x8] sm:$0xff]  ;;  %v119_v48 = vlaneseq }
   0x6   :  { %3228 = vmatprep.subr.bf16.mxu0 %v3453_v3  ;;  %v3550_v15 = vld [vmem:[%s3886_s1] sm:$0xff]  ;;  %v32_v30 = vld [vmem:[%s3888_s3 + $0x10] sm:$0xff]  ;;  %v33_v32 = vld [vmem:[%s3888_s3 + $0x18] sm:$0xff]  ;;  %s3457_s22 = smov 64   ;;  %s3458_s23 = smov [#allocation2]  }
   0x7   :  { %v30_v28 = vld [vmem:[%s3888_s3] sm:$0xff]  ;;  %v3585_v33 = vpack.c.bf16 %v33_v32, %v32_v30  ;;  %v3602_v49 = vand.u32 127, %v119_v48  ;;  %s2783_s24 = sshll.u32 %s3458_s23, 4  ;;  %s2784_s24 = int_to_ptr.vmem [resolvable:$true] %s2783_s24 }
   0x8   :  { %3236 = vmatpush3.bf16.msra.mxu1 %v3527_v12  ;;  %v3579_v31 = vpack.c.bf16 %v31_v29, %v30_v28  ;;  %v2791_v37 = vld [vmem:[%s3890_s5] ss:$0 sm:$0xff]  ;;  %s3456_s5 = smov 32   ;;  %s3429_s25 = scalar_lea.vmem %s2784_s24, 128 }
   0x9   :  { %3230 = vmatpush3.bf16.msra.mxu0 %v3229_v13  ;;  %2980 = vmatprep.subr.mxu1 %v3455_v11  ;;  %vm121_vm3 = vcmp.lt.s32.totalorder %v3602_v49, 96  ;;  %p3430_p0 = scmp.ne.s32.totalorder %s2784_s24, %s3429_s25  ;;  %p3434_p1 = scmp.lt.s32.totalorder %s2784_s24, %s2784_s24 }
   0xa   :  { %3237 = vmatprep.subr.bf16.mxu0 %v3453_v3  ;;  %p3435_p2 = scmp.lt.s32.totalorder %s3429_s25, %s3429_s25 }
   0xb   :  { %2978 = vmatmul.mubr.msk.f32.vlgmr.msra.gmra.mrb[0].mxu1 %vm45_vm1, %v3535_v14 }
   0xc   :  { %2967 = vmatmul.mubr.msk.f32.vlgmr.msra.gmra.mrb[0].mxu0 %vm45_vm1, %v3535_v14  ;;  %2982 = vmatprep.mubr.msk.f32.mxu1 %vm3454_vm0, %v3455_v11  ;;  %p3436_p3 = por %p3435_p2, %p3434_p1 }
   0xd   :  { %2998 = vmatprep.mubr.msk.f32.mxu0 %vm3454_vm0, %v3455_v11  ;;  %3239 = vmatpush3.bf16.msra.mxu0 %v3579_v31 }
   0xe   :  { %3240 = vmatprep.subr.bf16.mxu0 %v3453_v3  ;;  %p3437_p4 = pnand %p3436_p3, %p3430_p0 }
  0x11   :  { %2981 = vmatpush3.xpose.msk.msra.mxu1 %vm45_vm1, %v3550_v15  ;;  %3242 = vmatpush3.bf16.msra.mxu0 %v3585_v33 }
  0x12   :  { %2985 = vmatprep.subr.mxu1 %v3455_v11  ;;  %3012 = vmatprep.subr.mxu0 %v3455_v11 }
  0x14   :  { %2983 = vmatmul.mubr.msk.f32.vlgmr.msra.gmra.mrb[2].mxu1 %vm45_vm1, %v3535_v14 }
  0x15   :  { %2986 = vmatpush3.msra.mxu1 %v3550_v15  ;;  %2987 = vmatprep.mubr.msk.f32.mxu1 %vm3454_vm0, %v3455_v11 }
  0x16   :  { %3243 = vmatprep.subr.bf16.mxu1 %v3453_v3 }
  0xde   :  { %v188_v16 = vpop.f32.mrb[0].mxu1 }
  0xdf   :  { %v115_v17 = vpop.f32.mrb[0].mxu0  ;;  %v2979_v18 = vpop.f32.mrb[1].mxu1 }
  0xe0   :  { %v2968_v19 = vpop.f32.mrb[1].mxu0  ;;  %v3599_v38 = vadd.f32 %v2791_v37, %v115_v17 }
  0xe2   :  { %v423_v41 = vadd.f32 %v188_v16, %v3599_v38 }
  0xe7   :  { %v261_v20 = vpop.f32.mrb[2].mxu1 }
  0xe8   :  { %v2984_v21 = vpop.f32.mrb[3].mxu1  ;;  %v266_v22 = vsel %vm265_vm2, %v261_v20, -inf }
  0xe9   :  { %267 = vmax.xlane.f32.xlu0 %v266_v22 }
 0x176   :  { %v268_v23 = vpop.xlane.xlu0 %267 }
 0x177   :  { %v269_v24 = vsub.f32 %v261_v20, %v268_v23 }
 0x179   :  { %v270_v25 = vmul.f32 1.442695, %v269_v24 }
 0x17b   :  { %3333 = vpow2.f32 %v270_v25 }
 0x185   :  { %v3334_v26 = vpop.eup %3333 }
 0x186   :  { %2988 = vmatmul.mubr.msk.f32.vlgmr.msra.gmra.mrb[4].mxu1 %vm265_vm2, %v3334_v26  ;;  %v272_v27 = vsel %vm265_vm2, %v3334_v26, 0.0 }
 0x187   :  { %273 = vadd.xlane.f32.xlu0 %v272_v27  ;;  %3245 = vmatpush3.bf16.msra.mxu1 %v3504_v4 }
 0x188   :  { %3246 = vmatprep.subr.bf16.mxu1 %v3453_v3  ;;  %3009 = vmatprep.mubr.msk.f32.mxu1 %vm3454_vm0, %v3455_v11 }
 0x18b   :  { %3248 = vmatpush3.bf16.msra.mxu1 %v3527_v12 }
 0x18c   :  { %3017 = vmatprep.subr.mxu1 %v3455_v11 }
 0x214   :  { %v274_v36 = vpop.xlane.xlu0 %273 }
 0x215   :  { %3335 = vrcp.f32 %v274_v36 }
 0x21f   :  { %v3336_v39 = vpop.eup %3335 }
 0x259   :  { %v346_v34 = vpop.f32.mrb[4].mxu1 }
 0x25a   :  { %v2989_v35 = vpop.f32.mrb[5].mxu1  ;;  %2999 = vmatmul.mubr.msk.f32.vlgmr.msra.gmra.mrb[2].mxu0 %vm45_vm1, %v346_v34 }
 0x25b   :  { %3013 = vmatpush3.xpose.msk.msra.mxu0 %vm45_vm1, %v3550_v15  ;;  %3014 = vmatprep.mubr.msk.f32.mxu0 %vm3454_vm0, %v3455_v11 }
 0x25c   :  { %3249 = vmatprep.subr.bf16.mxu0 %v3453_v3 }
 0x32d   :  { %v419_v40 = vpop.f32.mrb[2].mxu0 }
 0x32e   :  { %v424_v42 = vmul.f32 %v3336_v39, %v419_v40  ;;  %v3000_v43 = vpop.f32.mrb[3].mxu0 }
 0x330   :  { %v425_v44 = vadd.f32 %v424_v42, %v423_v41 }
 0x332   :  { %v2798_v45 = vmul.f32 -1.442695, %v425_v44 }
 0x334   :  { %3337 = vpow2.f32 %v2798_v45 }
 0x335   :  { %3339 = vtanh.f32 %v425_v44 }
 0x33e   :  { %v3338_v46 = vpop.eup %3337 }
 0x33f   :  { %v429_v47 = vadd.f32 1.0, %v3338_v46  ;;  %v3340_v50 = vpop.eup %3339 }
 0x341   :  { %3341 = vrcp.f32 %v429_v47 }
 0x34b   :  { %v3342_v51 = vpop.eup %3341 }
 0x34c   :  { %v433_v52 = vsel %vm121_vm3, %v3342_v51, %v3340_v50 }
 0x34d   :  { %436 = vrot.lane.b32.xlu1 %v433_v52, %s3456_s5  ;;  %v434_v55 = vmul.f32 0.0, %v433_v52 }
 0x3bf   :  { %v437_v53 = vpop.permute.xlu1 %436 }
 0x3c0   :  { %v439_v54 = vmul.f32 %v437_v53, %v433_v52 }
 0x3c2   :  { %441 = vrot.lane.b32.xlu1 %v439_v54, %s3456_s5 }
 0x3c6   :  { %451 = vrot.lane.b32.xlu1 %v3535_v14, %s3457_s22 }
 0x434   :  { %v442_v56 = vpop.permute.xlu1 %441 }
 0x435   :  { %v3611_v57 = vadd.f32 %v442_v56, %v434_v55 }
 0x437   :  { %3343 = vtanh.f32 %v3611_v57 }
 0x438   :  { %v3615_v60 = vpop.permute.xlu1 %451 }
 0x441   :  { %v3344_v58 = vpop.eup %3343 }
 0x442   :  { %447 = vrot.lane.b32.xlu0 %v3344_v58, %s3456_s5 }
 0x4b4   :  { %v448_v59 = vpop.permute.xlu0 %447 }
 0x4b5   :  { %v450_v61 = vmul.f32 %v448_v59, %v433_v52 }
 0x4b7   :  { %v454_v62 = vadd.f32 %v3615_v60, %v450_v61 }
 0x4b9   :  { %456 = vrot.lane.b32.xlu1 %v454_v62, %s3457_s22 }
 0x52b   :  { %v457_v63 = vpop.permute.xlu1 %456 }
 0x52c   :  { %3010 = vmatmul.mubr.msk.f32.vlgmr.msra.gmra.mrb[6].mxu1 %vm45_vm1, %v457_v63  ;;  %3015 = vmatmul.mubr.msk.f32.vlgmr.msra.gmra.mrb[4].mxu0 %vm45_vm1, %v457_v63 }
 0x52d   :  { %3018 = vmatpush3.msra.mxu1 %v3550_v15  ;;  %3019 = vmatprep.mubr.msk.f32.mxu1 %vm3454_vm0, %v3455_v11 }
 0x52e   :  { %3251 = vmatpush3.bf16.msra.mxu0 %v3579_v31  ;;  %3030 = vmatprep.mubr.msk.f32.mxu0 %vm3454_vm0, %v3455_v11 }
 0x52f   :  { %3252 = vmatprep.subr.bf16.mxu0 %v3453_v3  ;;  %3255 = vmatprep.subr.bf16.mxu1 %v3453_v3 }
 0x532   :  { %3254 = vmatpush3.bf16.msra.mxu0 %v3585_v33 }
 0x533   :  { %3044 = vmatprep.subr.mxu0 %v3455_v11 }
 0x5ff   :  { %v526_v0 = vpop.f32.mrb[6].mxu1  ;;  %v596_v1 = vpop.f32.mrb[4].mxu0 }
 0x600   :  { %v3011_v2 = vpop.f32.mrb[7].mxu1  ;;  %v3016_v5 = vpop.f32.mrb[5].mxu0  ;;  %v600_v6 = vsel %vm265_vm2, %v596_v1, -inf  ;;  %v757_v20 = vadd.f32 %v526_v0, %v3599_v38 }
 0x601   :  { %601 = vmax.xlane.f32.xlu1 %v600_v6 }
 0x68e   :  { %v602_v7 = vpop.xlane.xlu1 %601 }
 0x68f   :  { %v603_v8 = vsub.f32 %v596_v1, %v602_v7 }
 0x691   :  { %v604_v9 = vmul.f32 1.442695, %v603_v8 }
 0x693   :  { %3345 = vpow2.f32 %v604_v9 }
 0x69d   :  { %v3346_v10 = vpop.eup %3345 }
 0x69e   :  { %3020 = vmatmul.mubr.msk.f32.vlgmr.msra.gmra.mrb[8].mxu1 %vm265_vm2, %v3346_v10  ;;  %v606_v13 = vsel %vm265_vm2, %v3346_v10, 0.0 }
 0x69f   :  { %607 = vadd.xlane.f32.xlu0 %v606_v13  ;;  %3257 = vmatpush3.bf16.msra.mxu1 %v3504_v4 }
 0x6a0   :  { %3258 = vmatprep.subr.bf16.mxu1 %v3453_v3  ;;  %3041 = vmatprep.mubr.msk.f32.mxu1 %vm3454_vm0, %v3455_v11 }
 0x6a3   :  { %3260 = vmatpush3.bf16.msra.mxu1 %v3527_v12 }
 0x6a4   :  { %3049 = vmatprep.subr.mxu1 %v3455_v11 }
 0x72c   :  { %v608_v17 = vpop.xlane.xlu0 %607 }
 0x72d   :  { %3347 = vrcp.f32 %v608_v17 }
 0x737   :  { %v3348_v18 = vpop.eup %3347 }
 0x771   :  { %v680_v14 = vpop.f32.mrb[8].mxu1 }
 0x772   :  { %v3021_v16 = vpop.f32.mrb[9].mxu1  ;;  %3031 = vmatmul.mubr.msk.f32.vlgmr.msra.gmra.mrb[6].mxu0 %vm45_vm1, %v680_v14 }
 0x773   :  { %3045 = vmatpush3.xpose.msk.msra.mxu0 %vm45_vm1, %v3550_v15  ;;  %3046 = vmatprep.mubr.msk.f32.mxu0 %vm3454_vm0, %v3455_v11 }
 0x774   :  { %3261 = vmatprep.subr.bf16.mxu0 %v3453_v3 }
 0x845   :  { %v753_v19 = vpop.f32.mrb[6].mxu0 }
 0x846   :  { %v758_v21 = vmul.f32 %v3348_v18, %v753_v19  ;;  %v3032_v22 = vpop.f32.mrb[7].mxu0 }
 0x848   :  { %v759_v23 = vadd.f32 %v758_v21, %v757_v20 }
 0x84a   :  { %v2804_v24 = vmul.f32 -1.442695, %v759_v23 }
 0x84c   :  { %3349 = vpow2.f32 %v2804_v24 }
 0x84d   :  { %3351 = vtanh.f32 %v759_v23 }
 0x856   :  { %v3350_v25 = vpop.eup %3349 }
 0x857   :  { %v763_v26 = vadd.f32 1.0, %v3350_v25  ;;  %v3352_v27 = vpop.eup %3351 }
 0x859   :  { %3353 = vrcp.f32 %v763_v26 }
 0x863   :  { %v3354_v28 = vpop.eup %3353 }
 0x864   :  { %v767_v29 = vsel %vm121_vm3, %v3354_v28, %v3352_v27 }
 0x865   :  { %770 = vrot.lane.b32.xlu1 %v767_v29, %s3456_s5  ;;  %v768_v34 = vmul.f32 %v767_v29, %v3611_v57 }
 0x8d7   :  { %v771_v30 = vpop.permute.xlu1 %770 }
 0x8d8   :  { %v773_v32 = vmul.f32 %v771_v30, %v767_v29 }
 0x8da   :  { %775 = vrot.lane.b32.xlu0 %v773_v32, %s3456_s5 }
 0x94c   :  { %v776_v35 = vpop.permute.xlu0 %775 }
 0x94d   :  { %v3652_v36 = vadd.f32 %v776_v35, %v768_v34 }
 0x94f   :  { %3355 = vtanh.f32 %v3652_v36 }
 0x959   :  { %v3356_v37 = vpop.eup %3355 }
 0x95a   :  { %781 = vrot.lane.b32.xlu1 %v3356_v37, %s3456_s5 }
 0x9cc   :  { %v782_v39 = vpop.permute.xlu1 %781 }
 0x9cd   :  { %v784_v40 = vmul.f32 %v782_v39, %v767_v29 }
 0x9cf   :  { %v785_v41 = vadd.f32 %v784_v40, %v3615_v60 }
 0x9d1   :  { %787 = vrot.lane.b32.xlu1 %v785_v41, %s3457_s22 }
 0xa43   :  { %v788_v42 = vpop.permute.xlu1 %787 }
 0xa44   :  { %3042 = vmatmul.mubr.msk.f32.vlgmr.msra.gmra.mrb[10].mxu1 %vm45_vm1, %v788_v42  ;;  %3047 = vmatmul.mubr.msk.f32.vlgmr.msra.gmra.mrb[8].mxu0 %vm45_vm1, %v788_v42 }
 0xa45   :  { %3050 = vmatpush3.msra.mxu1 %v3550_v15  ;;  %3051 = vmatprep.mubr.msk.f32.mxu1 %vm3454_vm0, %v3455_v11 }
 0xa46   :  { %3263 = vmatpush3.bf16.msra.mxu0 %v3579_v31  ;;  %3062 = vmatprep.mubr.msk.f32.mxu0 %vm3454_vm0, %v3455_v11 }
 0xa47   :  { %3264 = vmatprep.subr.bf16.mxu0 %v3453_v3  ;;  %3267 = vmatprep.subr.bf16.mxu1 %v3453_v3 }
 0xa4a   :  { %3266 = vmatpush3.bf16.msra.mxu0 %v3585_v33 }
 0xa4b   :  { %3076 = vmatprep.subr.mxu0 %v3455_v11 }
 0xb17   :  { %v857_v43 = vpop.f32.mrb[10].mxu1  ;;  %v927_v44 = vpop.f32.mrb[8].mxu0 }
 0xb18   :  { %v3043_v45 = vpop.f32.mrb[11].mxu1  ;;  %v3048_v46 = vpop.f32.mrb[9].mxu0  ;;  %v931_v47 = vsel %vm265_vm2, %v927_v44, -inf  ;;  %v1088_v59 = vadd.f32 %v857_v43, %v3599_v38 }
 0xb19   :  { %932 = vmax.xlane.f32.xlu1 %v931_v47 }
 0xba6   :  { %v933_v48 = vpop.xlane.xlu1 %932 }
 0xba7   :  { %v934_v50 = vsub.f32 %v927_v44, %v933_v48 }
 0xba9   :  { %v935_v51 = vmul.f32 1.442695, %v934_v50 }
 0xbab   :  { %3357 = vpow2.f32 %v935_v51 }
 0xbb5   :  { %v3358_v52 = vpop.eup %3357 }
 0xbb6   :  { %3052 = vmatmul.mubr.msk.f32.vlgmr.msra.gmra.mrb[12].mxu1 %vm265_vm2, %v3358_v52  ;;  %v937_v53 = vsel %vm265_vm2, %v3358_v52, 0.0 }
 0xbb7   :  { %938 = vadd.xlane.f32.xlu0 %v937_v53  ;;  %3269 = vmatpush3.bf16.msra.mxu1 %v3504_v4 }
 0xbb8   :  { %3270 = vmatprep.subr.bf16.mxu1 %v3453_v3  ;;  %3073 = vmatprep.mubr.msk.f32.mxu1 %vm3454_vm0, %v3455_v11 }
 0xbbb   :  { %3272 = vmatpush3.bf16.msra.mxu1 %v3527_v12 }
 0xbbc   :  { %3081 = vmatprep.subr.mxu1 %v3455_v11 }
 0xc44   :  { %v939_v56 = vpop.xlane.xlu0 %938 }
 0xc45   :  { %3359 = vrcp.f32 %v939_v56 }
 0xc4f   :  { %v3360_v57 = vpop.eup %3359 }
 0xc89   :  { %v1011_v54 = vpop.f32.mrb[12].mxu1 }
 0xc8a   :  { %v3053_v55 = vpop.f32.mrb[13].mxu1  ;;  %3063 = vmatmul.mubr.msk.f32.vlgmr.msra.gmra.mrb[10].mxu0 %vm45_vm1, %v1011_v54 }
 0xc8b   :  { %3077 = vmatpush3.xpose.msk.msra.mxu0 %vm45_vm1, %v3550_v15  ;;  %3078 = vmatprep.mubr.msk.f32.mxu0 %vm3454_vm0, %v3455_v11 }
 0xc8c   :  { %3273 = vmatprep.subr.bf16.mxu0 %v3453_v3 }
 0xd5d   :  { %v1084_v58 = vpop.f32.mrb[10].mxu0 }
 0xd5e   :  { %v1089_v61 = vmul.f32 %v3360_v57, %v1084_v58  ;;  %v3064_v62 = vpop.f32.mrb[11].mxu0 }
 0xd60   :  { %v1090_v63 = vadd.f32 %v1089_v61, %v1088_v59 }
 0xd62   :  { %v2810_v0 = vmul.f32 -1.442695, %v1090_v63 }
 0xd64   :  { %3361 = vpow2.f32 %v2810_v0 }
 0xd65   :  { %3363 = vtanh.f32 %v1090_v63 }
 0xd6e   :  { %v3362_v1 = vpop.eup %3361 }
 0xd6f   :  { %v1094_v2 = vadd.f32 1.0, %v3362_v1  ;;  %v3364_v5 = vpop.eup %3363 }
 0xd71   :  { %3365 = vrcp.f32 %v1094_v2 }
 0xd7b   :  { %v3366_v6 = vpop.eup %3365 }
 0xd7c   :  { %v1098_v7 = vsel %vm121_vm3, %v3366_v6, %v3364_v5 }
 0xd7d   :  { %1101 = vrot.lane.b32.xlu1 %v1098_v7, %s3456_s5  ;;  %v1099_v10 = vmul.f32 %v1098_v7, %v3652_v36 }
 0xdef   :  { %v1102_v8 = vpop.permute.xlu1 %1101 }
 0xdf0   :  { %v1104_v9 = vmul.f32 %v1102_v8, %v1098_v7 }
 0xdf2   :  { %1106 = vrot.lane.b32.xlu0 %v1104_v9, %s3456_s5 }
 0xe64   :  { %v1107_v13 = vpop.permute.xlu0 %1106 }
 0xe65   :  { %v3691_v14 = vadd.f32 %v1107_v13, %v1099_v10 }
 0xe67   :  { %3367 = vtanh.f32 %v3691_v14 }
 0xe71   :  { %v3368_v16 = vpop.eup %3367 }
 0xe72   :  { %1112 = vrot.lane.b32.xlu1 %v3368_v16, %s3456_s5 }
 0xee4   :  { %v1113_v17 = vpop.permute.xlu1 %1112 }
 0xee5   :  { %v1115_v18 = vmul.f32 %v1113_v17, %v1098_v7 }
 0xee7   :  { %v1116_v19 = vadd.f32 %v1115_v18, %v3615_v60 }
 0xee9   :  { %1118 = vrot.lane.b32.xlu1 %v1116_v19, %s3457_s22 }
 0xf5b   :  { %v1119_v20 = vpop.permute.xlu1 %1118 }
 0xf5c   :  { %3074 = vmatmul.mubr.msk.f32.vlgmr.msra.gmra.mrb[14].mxu1 %vm45_vm1, %v1119_v20  ;;  %3079 = vmatmul.mubr.msk.f32.vlgmr.msra.gmra.mrb[12].mxu0 %vm45_vm1, %v1119_v20 }
 0xf5d   :  { %3082 = vmatpush3.msra.mxu1 %v3550_v15  ;;  %3083 = vmatprep.mubr.msk.f32.mxu1 %vm3454_vm0, %v3455_v11 }
 0xf5e   :  { %3275 = vmatpush3.bf16.msra.mxu0 %v3579_v31  ;;  %3094 = vmatprep.mubr.msk.f32.mxu0 %vm3454_vm0, %v3455_v11 }
 0xf5f   :  { %3276 = vmatprep.subr.bf16.mxu0 %v3453_v3  ;;  %3279 = vmatprep.subr.bf16.mxu1 %v3453_v3 }
 0xf62   :  { %3278 = vmatpush3.bf16.msra.mxu0 %v3585_v33 }
 0xf63   :  { %3108 = vmatprep.subr.mxu0 %v3455_v11 }
0x102f   :  { %v1188_v21 = vpop.f32.mrb[14].mxu1  ;;  %v1258_v22 = vpop.f32.mrb[12].mxu0 }
0x1030   :  { %v3075_v23 = vpop.f32.mrb[15].mxu1  ;;  %v3080_v24 = vpop.f32.mrb[13].mxu0  ;;  %v1262_v25 = vsel %vm265_vm2, %v1258_v22, -inf  ;;  %v1419_v39 = vadd.f32 %v1188_v21, %v3599_v38 }
0x1031   :  { %1263 = vmax.xlane.f32.xlu0 %v1262_v25 }
0x10be   :  { %v1264_v26 = vpop.xlane.xlu0 %1263 }
0x10bf   :  { %v1265_v27 = vsub.f32 %v1258_v22, %v1264_v26 }
0x10c1   :  { %v1266_v28 = vmul.f32 1.442695, %v1265_v27 }
0x10c3   :  { %3369 = vpow2.f32 %v1266_v28 }
0x10cd   :  { %v3370_v29 = vpop.eup %3369 }
0x10ce   :  { %3084 = vmatmul.mubr.msk.f32.vlgmr.msra.gmra.mrb[16].mxu1 %vm265_vm2, %v3370_v29  ;;  %v1268_v30 = vsel %vm265_vm2, %v3370_v29, 0.0 }
0x10cf   :  { %1269 = vadd.xlane.f32.xlu1 %v1268_v30  ;;  %3281 = vmatpush3.bf16.msra.mxu1 %v3504_v4 }
0x10d0   :  { %3282 = vmatprep.subr.bf16.mxu1 %v3453_v3  ;;  %3105 = vmatprep.mubr.msk.f32.mxu1 %vm3454_vm0, %v3455_v11 }
0x10d3   :  { %3284 = vmatpush3.bf16.msra.mxu1 %v3527_v12 }
0x10d4   :  { %3113 = vmatprep.subr.mxu1 %v3455_v11 }
0x115c   :  { %v1270_v35 = vpop.xlane.xlu1 %1269 }
0x115d   :  { %3371 = vrcp.f32 %v1270_v35 }
0x1167   :  { %v3372_v36 = vpop.eup %3371 }
0x11a1   :  { %v1342_v32 = vpop.f32.mrb[16].mxu1 }
0x11a2   :  { %v3085_v34 = vpop.f32.mrb[17].mxu1  ;;  %3095 = vmatmul.mubr.msk.f32.vlgmr.msra.gmra.mrb[14].mxu0 %vm45_vm1, %v1342_v32 }
0x11a3   :  { %3109 = vmatpush3.xpose.msk.msra.mxu0 %vm45_vm1, %v3550_v15  ;;  %3110 = vmatprep.mubr.msk.f32.mxu0 %vm3454_vm0, %v3455_v11 }
0x11a4   :  { %3285 = vmatprep.subr.bf16.mxu0 %v3453_v3 }
0x1275   :  { %v1415_v37 = vpop.f32.mrb[14].mxu0 }
0x1276   :  { %v1420_v40 = vmul.f32 %v3372_v36, %v1415_v37  ;;  %v3096_v41 = vpop.f32.mrb[15].mxu0 }
0x1278   :  { %v1421_v42 = vadd.f32 %v1420_v40, %v1419_v39 }
0x127a   :  { %v2816_v43 = vmul.f32 -1.442695, %v1421_v42 }
0x127c   :  { %3373 = vpow2.f32 %v2816_v43 }
0x127d   :  { %3375 = vtanh.f32 %v1421_v42 }
0x1286   :  { %v3374_v44 = vpop.eup %3373 }
0x1287   :  { %v1425_v45 = vadd.f32 1.0, %v3374_v44  ;;  %v3376_v46 = vpop.eup %3375 }
0x1289   :  { %3377 = vrcp.f32 %v1425_v45 }
0x1293   :  { %v3378_v47 = vpop.eup %3377 }
0x1294   :  { %v1429_v48 = vsel %vm121_vm3, %v3378_v47, %v3376_v46 }
0x1295   :  { %1432 = vrot.lane.b32.xlu0 %v1429_v48, %s3456_s5  ;;  %v1430_v52 = vmul.f32 %v1429_v48, %v3691_v14 }
0x1307   :  { %v1433_v50 = vpop.permute.xlu0 %1432 }
0x1308   :  { %v1435_v51 = vmul.f32 %v1433_v50, %v1429_v48 }
0x130a   :  { %1437 = vrot.lane.b32.xlu1 %v1435_v51, %s3456_s5 }
0x137c   :  { %v1438_v53 = vpop.permute.xlu1 %1437 }
0x137d   :  { %v3730_v54 = vadd.f32 %v1438_v53, %v1430_v52 }
0x137f   :  { %3379 = vtanh.f32 %v3730_v54 }
0x1389   :  { %v3380_v55 = vpop.eup %3379 }
0x138a   :  { %1443 = vrot.lane.b32.xlu0 %v3380_v55, %s3456_s5 }
0x13fc   :  { %v1444_v56 = vpop.permute.xlu0 %1443 }
0x13fd   :  { %v1446_v57 = vmul.f32 %v1444_v56, %v1429_v48 }
0x13ff   :  { %v1447_v58 = vadd.f32 %v1446_v57, %v3615_v60 }
0x1401   :  { %1449 = vrot.lane.b32.xlu1 %v1447_v58, %s3457_s22 }
0x1473   :  { %v1450_v59 = vpop.permute.xlu1 %1449 }
0x1474   :  { %3106 = vmatmul.mubr.msk.f32.vlgmr.msra.gmra.mrb[18].mxu1 %vm45_vm1, %v1450_v59  ;;  %3111 = vmatmul.mubr.msk.f32.vlgmr.msra.gmra.mrb[16].mxu0 %vm45_vm1, %v1450_v59 }
0x1475   :  { %3114 = vmatpush3.msra.mxu1 %v3550_v15  ;;  %3115 = vmatprep.mubr.msk.f32.mxu1 %vm3454_vm0, %v3455_v11 }
0x1476   :  { %3287 = vmatpush3.bf16.msra.mxu0 %v3579_v31  ;;  %3126 = vmatprep.mubr.msk.f32.mxu0 %vm3454_vm0, %v3455_v11 }
0x1477   :  { %3288 = vmatprep.subr.bf16.mxu0 %v3453_v3  ;;  %3291 = vmatprep.subr.bf16.mxu1 %v3453_v3 }
0x147a   :  { %3290 = vmatpush3.bf16.msra.mxu0 %v3585_v33 }
0x147b   :  { %3140 = vmatprep.subr.mxu0 %v3455_v11 }
0x1547   :  { %v1519_v61 = vpop.f32.mrb[18].mxu1  ;;  %v1589_v62 = vpop.f32.mrb[16].mxu0 }
0x1548   :  { %v3107_v63 = vpop.f32.mrb[19].mxu1  ;;  %v3112_v0 = vpop.f32.mrb[17].mxu0  ;;  %v1593_v1 = vsel %vm265_vm2, %v1589_v62, -inf  ;;  %v1750_v17 = vadd.f32 %v1519_v61, %v3599_v38 }
0x1549   :  { %1594 = vmax.xlane.f32.xlu0 %v1593_v1 }
0x15d6   :  { %v1595_v2 = vpop.xlane.xlu0 %1594 }
0x15d7   :  { %v1596_v5 = vsub.f32 %v1589_v62, %v1595_v2 }
0x15d9   :  { %v1597_v6 = vmul.f32 1.442695, %v1596_v5 }
0x15db   :  { %3381 = vpow2.f32 %v1597_v6 }
0x15e5   :  { %v3382_v7 = vpop.eup %3381 }
0x15e6   :  { %3116 = vmatmul.mubr.msk.f32.vlgmr.msra.gmra.mrb[20].mxu1 %vm265_vm2, %v3382_v7  ;;  %v1599_v8 = vsel %vm265_vm2, %v3382_v7, 0.0 }
0x15e7   :  { %1600 = vadd.xlane.f32.xlu1 %v1599_v8  ;;  %3293 = vmatpush3.bf16.msra.mxu1 %v3504_v4 }
0x15e8   :  { %3294 = vmatprep.subr.bf16.mxu1 %v3453_v3  ;;  %3137 = vmatprep.mubr.msk.f32.mxu1 %vm3454_vm0, %v3455_v11 }
0x15eb   :  { %3296 = vmatpush3.bf16.msra.mxu1 %v3527_v12 }
0x15ec   :  { %3145 = vmatprep.subr.mxu1 %v3455_v11 }
0x1674   :  { %v1601_v13 = vpop.xlane.xlu1 %1600 }
0x1675   :  { %3383 = vrcp.f32 %v1601_v13 }
0x167f   :  { %v3384_v14 = vpop.eup %3383 }
0x16b9   :  { %v1673_v9 = vpop.f32.mrb[20].mxu1 }
0x16ba   :  { %v3117_v10 = vpop.f32.mrb[21].mxu1  ;;  %3127 = vmatmul.mubr.msk.f32.vlgmr.msra.gmra.mrb[18].mxu0 %vm45_vm1, %v1673_v9 }
0x16bb   :  { %3141 = vmatpush3.xpose.msk.msra.mxu0 %vm45_vm1, %v3550_v15  ;;  %3142 = vmatprep.mubr.msk.f32.mxu0 %vm3454_vm0, %v3455_v11 }
0x16bc   :  { %3297 = vmatprep.subr.bf16.mxu0 %v3453_v3 }
0x178d   :  { %v1746_v16 = vpop.f32.mrb[18].mxu0 }
0x178e   :  { %v1751_v18 = vmul.f32 %v3384_v14, %v1746_v16  ;;  %v3128_v19 = vpop.f32.mrb[19].mxu0 }
0x1790   :  { %v1752_v20 = vadd.f32 %v1751_v18, %v1750_v17 }
0x1792   :  { %v2822_v21 = vmul.f32 -1.442695, %v1752_v20 }
0x1794   :  { %3385 = vpow2.f32 %v2822_v21 }
0x1795   :  { %3387 = vtanh.f32 %v1752_v20 }
0x179e   :  { %v3386_v22 = vpop.eup %3385 }
0x179f   :  { %v1756_v23 = vadd.f32 1.0, %v3386_v22  ;;  %v3388_v24 = vpop.eup %3387 }
0x17a1   :  { %3389 = vrcp.f32 %v1756_v23 }
0x17ab   :  { %v3390_v25 = vpop.eup %3389 }
0x17ac   :  { %v1760_v26 = vsel %vm121_vm3, %v3390_v25, %v3388_v24 }
0x17ad   :  { %1763 = vrot.lane.b32.xlu0 %v1760_v26, %s3456_s5  ;;  %v1761_v29 = vmul.f32 %v1760_v26, %v3730_v54 }
0x181f   :  { %v1764_v27 = vpop.permute.xlu0 %1763 }
0x1820   :  { %v1766_v28 = vmul.f32 %v1764_v27, %v1760_v26 }
0x1822   :  { %1768 = vrot.lane.b32.xlu1 %v1766_v28, %s3456_s5 }
0x1894   :  { %v1769_v30 = vpop.permute.xlu1 %1768 }
0x1895   :  { %v3769_v32 = vadd.f32 %v1769_v30, %v1761_v29 }
0x1897   :  { %3391 = vtanh.f32 %v3769_v32 }
0x18a1   :  { %v3392_v34 = vpop.eup %3391 }
0x18a2   :  { %1774 = vrot.lane.b32.xlu0 %v3392_v34, %s3456_s5 }
0x1914   :  { %v1775_v35 = vpop.permute.xlu0 %1774 }
0x1915   :  { %v1777_v36 = vmul.f32 %v1775_v35, %v1760_v26 }
0x1917   :  { %v1778_v37 = vadd.f32 %v1777_v36, %v3615_v60 }
0x1919   :  { %1780 = vrot.lane.b32.xlu1 %v1778_v37, %s3457_s22 }
0x198b   :  { %v1781_v39 = vpop.permute.xlu1 %1780 }
0x198c   :  { %3138 = vmatmul.mubr.msk.f32.vlgmr.msra.gmra.mrb[22].mxu1 %vm45_vm1, %v1781_v39  ;;  %3143 = vmatmul.mubr.msk.f32.vlgmr.msra.gmra.mrb[20].mxu0 %vm45_vm1, %v1781_v39 }
0x198d   :  { %3146 = vmatpush3.msra.mxu1 %v3550_v15  ;;  %3147 = vmatprep.mubr.msk.f32.mxu1 %vm3454_vm0, %v3455_v11 }
0x198e   :  { %3299 = vmatpush3.bf16.msra.mxu0 %v3579_v31  ;;  %3158 = vmatprep.mubr.msk.f32.mxu0 %vm3454_vm0, %v3455_v11 }
0x198f   :  { %3300 = vmatprep.subr.bf16.mxu0 %v3453_v3  ;;  %3303 = vmatprep.subr.bf16.mxu1 %v3453_v3 }
0x1992   :  { %3302 = vmatpush3.bf16.msra.mxu0 %v3585_v33 }
0x1993   :  { %3172 = vmatprep.subr.mxu0 %v3455_v11 }
0x1a5f   :  { %v1850_v40 = vpop.f32.mrb[22].mxu1  ;;  %v1920_v41 = vpop.f32.mrb[20].mxu0 }
0x1a60   :  { %v3139_v42 = vpop.f32.mrb[23].mxu1  ;;  %v3144_v43 = vpop.f32.mrb[21].mxu0  ;;  %v1924_v44 = vsel %vm265_vm2, %v1920_v41, -inf  ;;  %v2081_v56 = vadd.f32 %v1850_v40, %v3599_v38 }
0x1a61   :  { %1925 = vmax.xlane.f32.xlu0 %v1924_v44 }
0x1aee   :  { %v1926_v45 = vpop.xlane.xlu0 %1925 }
0x1aef   :  { %v1927_v46 = vsub.f32 %v1920_v41, %v1926_v45 }
0x1af1   :  { %v1928_v47 = vmul.f32 1.442695, %v1927_v46 }
0x1af3   :  { %3393 = vpow2.f32 %v1928_v47 }
0x1afd   :  { %v3394_v48 = vpop.eup %3393 }
0x1afe   :  { %3148 = vmatmul.mubr.msk.f32.vlgmr.msra.gmra.mrb[24].mxu1 %vm265_vm2, %v3394_v48  ;;  %v1930_v50 = vsel %vm265_vm2, %v3394_v48, 0.0 }
0x1aff   :  { %1931 = vadd.xlane.f32.xlu1 %v1930_v50  ;;  %3305 = vmatpush3.bf16.msra.mxu1 %v3504_v4 }
0x1b00   :  { %3306 = vmatprep.subr.bf16.mxu1 %v3453_v3  ;;  %3169 = vmatprep.mubr.msk.f32.mxu1 %vm3454_vm0, %v3455_v11 }
0x1b03   :  { %3308 = vmatpush3.bf16.msra.mxu1 %v3527_v12 }
0x1b04   :  { %3177 = vmatprep.subr.mxu1 %v3455_v11 }
0x1b8c   :  { %v1932_v53 = vpop.xlane.xlu1 %1931 }
0x1b8d   :  { %3395 = vrcp.f32 %v1932_v53 }
0x1b97   :  { %v3396_v54 = vpop.eup %3395 }
0x1bd1   :  { %v2004_v51 = vpop.f32.mrb[24].mxu1 }
0x1bd2   :  { %v3149_v52 = vpop.f32.mrb[25].mxu1  ;;  %3159 = vmatmul.mubr.msk.f32.vlgmr.msra.gmra.mrb[22].mxu0 %vm45_vm1, %v2004_v51 }
0x1bd3   :  { %3173 = vmatpush3.xpose.msk.msra.mxu0 %vm45_vm1, %v3550_v15  ;;  %3174 = vmatprep.mubr.msk.f32.mxu0 %vm3454_vm0, %v3455_v11 }
0x1bd4   :  { %3309 = vmatprep.subr.bf16.mxu0 %v3453_v3 }
0x1ca5   :  { %v2077_v55 = vpop.f32.mrb[22].mxu0 }
0x1ca6   :  { %v2082_v57 = vmul.f32 %v3396_v54, %v2077_v55  ;;  %v3160_v58 = vpop.f32.mrb[23].mxu0 }
0x1ca8   :  { %v2083_v59 = vadd.f32 %v2082_v57, %v2081_v56 }
0x1caa   :  { %v2828_v61 = vmul.f32 -1.442695, %v2083_v59 }
0x1cac   :  { %3397 = vpow2.f32 %v2828_v61 }
0x1cad   :  { %3399 = vtanh.f32 %v2083_v59 }
0x1cb6   :  { %v3398_v62 = vpop.eup %3397 }
0x1cb7   :  { %v2087_v63 = vadd.f32 1.0, %v3398_v62  ;;  %v3400_v0 = vpop.eup %3399 }
0x1cb9   :  { %3401 = vrcp.f32 %v2087_v63 }
0x1cc3   :  { %v3402_v1 = vpop.eup %3401 }
0x1cc4   :  { %v2091_v2 = vsel %vm121_vm3, %v3402_v1, %v3400_v0 }
0x1cc5   :  { %2094 = vrot.lane.b32.xlu0 %v2091_v2, %s3456_s5  ;;  %v2092_v7 = vmul.f32 %v2091_v2, %v3769_v32 }
0x1d37   :  { %v2095_v5 = vpop.permute.xlu0 %2094 }
0x1d38   :  { %v2097_v6 = vmul.f32 %v2095_v5, %v2091_v2 }
0x1d3a   :  { %2099 = vrot.lane.b32.xlu1 %v2097_v6, %s3456_s5 }
0x1dac   :  { %v2100_v8 = vpop.permute.xlu1 %2099 }
0x1dad   :  { %v3808_v9 = vadd.f32 %v2100_v8, %v2092_v7 }
0x1daf   :  { %3403 = vtanh.f32 %v3808_v9 }
0x1db9   :  { %v3404_v10 = vpop.eup %3403 }
0x1dba   :  { %2105 = vrot.lane.b32.xlu0 %v3404_v10, %s3456_s5 }
0x1e2c   :  { %v2106_v13 = vpop.permute.xlu0 %2105 }
0x1e2d   :  { %v2108_v14 = vmul.f32 %v2106_v13, %v2091_v2 }
0x1e2f   :  { %v2109_v16 = vadd.f32 %v2108_v14, %v3615_v60 }
0x1e31   :  { %2111 = vrot.lane.b32.xlu1 %v2109_v16, %s3457_s22 }
0x1ea3   :  { %v2112_v17 = vpop.permute.xlu1 %2111 }
0x1ea4   :  { %3170 = vmatmul.mubr.msk.f32.vlgmr.msra.gmra.mrb[26].mxu1 %vm45_vm1, %v2112_v17  ;;  %3175 = vmatmul.mubr.msk.f32.vlgmr.msra.gmra.mrb[24].mxu0 %vm45_vm1, %v2112_v17 }
0x1ea5   :  { %3178 = vmatpush3.msra.mxu1 %v3550_v15  ;;  %3179 = vmatprep.mubr.msk.f32.mxu1 %vm3454_vm0, %v3455_v11 }
0x1ea6   :  { %3311 = vmatpush3.bf16.msra.mxu0 %v3579_v31  ;;  %3190 = vmatprep.mubr.msk.f32.mxu0 %vm3454_vm0, %v3455_v11 }
0x1ea7   :  { %3312 = vmatprep.subr.bf16.mxu0 %v3453_v3  ;;  %3315 = vmatprep.subr.bf16.mxu1 %v3453_v3 }
0x1eaa   :  { %3314 = vmatpush3.bf16.msra.mxu0 %v3585_v33 }
0x1eab   :  { %3204 = vmatprep.subr.mxu0 %v3455_v11 }
0x1f77   :  { %v2181_v18 = vpop.f32.mrb[26].mxu1  ;;  %v2251_v19 = vpop.f32.mrb[24].mxu0 }
0x1f78   :  { %v3171_v20 = vpop.f32.mrb[27].mxu1  ;;  %v3176_v21 = vpop.f32.mrb[25].mxu0  ;;  %v2255_v22 = vsel %vm265_vm2, %v2251_v19, -inf }
0x1f79   :  { %2256 = vmax.xlane.f32.xlu0 %v2255_v22 }
0x2006   :  { %v2257_v23 = vpop.xlane.xlu0 %2256 }
0x2007   :  { %v2258_v24 = vsub.f32 %v2251_v19, %v2257_v23 }
0x2009   :  { %v2259_v25 = vmul.f32 1.442695, %v2258_v24 }
0x200b   :  { %3405 = vpow2.f32 %v2259_v25 }
0x2015   :  { %v3406_v26 = vpop.eup %3405 }
0x2016   :  { %3180 = vmatmul.mubr.msk.f32.vlgmr.msra.gmra.mrb[28].mxu1 %vm265_vm2, %v3406_v26  ;;  %v2261_v27 = vsel %vm265_vm2, %v3406_v26, 0.0 }
0x2017   :  { %2262 = vadd.xlane.f32.xlu1 %v2261_v27  ;;  %3317 = vmatpush3.bf16.msra.mxu1 %v3504_v4 }
0x2018   :  { %3318 = vmatprep.subr.bf16.mxu1 %v3453_v3  ;;  %3201 = vmatprep.mubr.msk.f32.mxu1 %vm3454_vm0, %v3455_v11 }
0x201b   :  { %3320 = vmatpush3.bf16.msra.mxu1 %v3527_v12  ;;  %v2412_v12 = vadd.f32 %v2181_v18, %v3599_v38 }
0x201c   :  { %3209 = vmatprep.subr.mxu1 %v3455_v11 }
0x20a4   :  { %v2263_v4 = vpop.xlane.xlu1 %2262 }
0x20a5   :  { %3407 = vrcp.f32 %v2263_v4 }
0x20af   :  { %v3408_v30 = vpop.eup %3407 }
0x20e9   :  { %v2335_v28 = vpop.f32.mrb[28].mxu1 }
0x20ea   :  { %v3181_v29 = vpop.f32.mrb[29].mxu1  ;;  %3191 = vmatmul.mubr.msk.f32.vlgmr.msra.gmra.mrb[26].mxu0 %vm45_vm1, %v2335_v28 }
0x20eb   :  { %3205 = vmatpush3.xpose.msk.msra.mxu0 %vm45_vm1, %v3550_v15  ;;  %3206 = vmatprep.mubr.msk.f32.mxu0 %vm3454_vm0, %v3455_v11 }
0x20ec   :  { %3321 = vmatprep.subr.bf16.mxu0 %v3453_v3 }
0x21bd   :  { %v2408_v32 = vpop.f32.mrb[26].mxu0 }
0x21be   :  { %v2413_v34 = vmul.f32 %v3408_v30, %v2408_v32  ;;  %v3192_v35 = vpop.f32.mrb[27].mxu0 }
0x21c0   :  { %v2414_v36 = vadd.f32 %v2413_v34, %v2412_v12 }
0x21c2   :  { %v2834_v37 = vmul.f32 -1.442695, %v2414_v36 }
0x21c4   :  { %3409 = vpow2.f32 %v2834_v37 }
0x21c5   :  { %3411 = vtanh.f32 %v2414_v36 }
0x21ce   :  { %v3410_v39 = vpop.eup %3409 }
0x21cf   :  { %v2418_v40 = vadd.f32 1.0, %v3410_v39  ;;  %v3412_v41 = vpop.eup %3411 }
0x21d1   :  { %3413 = vrcp.f32 %v2418_v40 }
0x21db   :  { %v3414_v42 = vpop.eup %3413 }
0x21dc   :  { %v2422_v43 = vsel %vm121_vm3, %v3414_v42, %v3412_v41 }
0x21dd   :  { %2425 = vrot.lane.b32.xlu0 %v2422_v43, %s3456_s5  ;;  %v2423_v46 = vmul.f32 %v2422_v43, %v3808_v9 }
0x224f   :  { %v2426_v44 = vpop.permute.xlu0 %2425 }
0x2250   :  { %v2428_v45 = vmul.f32 %v2426_v44, %v2422_v43 }
0x2252   :  { %2430 = vrot.lane.b32.xlu1 %v2428_v45, %s3456_s5 }
0x22c4   :  { %v2431_v47 = vpop.permute.xlu1 %2430 }
0x22c5   :  { %v2433_v48 = vadd.f32 %v2431_v47, %v2423_v46 }
0x22c7   :  { %3415 = vtanh.f32 %v2433_v48 }
0x22d1   :  { %v3416_v50 = vpop.eup %3415 }
0x22d2   :  { %2436 = vrot.lane.b32.xlu0 %v3416_v50, %s3456_s5 }
0x2344   :  { %v2437_v51 = vpop.permute.xlu0 %2436 }
0x2345   :  { %v2439_v52 = vmul.f32 %v2437_v51, %v2422_v43 }
0x2347   :  { %v2440_v53 = vadd.f32 %v2439_v52, %v3615_v60 }
0x2349   :  { %2442 = vrot.lane.b32.xlu1 %v2440_v53, %s3457_s22 }
0x23bb   :  { %v2443_v54 = vpop.permute.xlu1 %2442 }
0x23bc   :  { %3202 = vmatmul.mubr.msk.f32.vlgmr.msra.gmra.mrb[30].mxu1 %vm45_vm1, %v2443_v54  ;;  %3207 = vmatmul.mubr.msk.f32.vlgmr.msra.gmra.mrb[28].mxu0 %vm45_vm1, %v2443_v54 }
0x23bd   :  { %3210 = vmatpush3.msra.mxu1 %v3550_v15  ;;  %3211 = vmatprep.mubr.msk.f32.mxu1 %vm3454_vm0, %v3455_v11 }
0x23be   :  { %3323 = vmatpush3.bf16.msra.mxu0 %v3579_v31  ;;  %3222 = vmatprep.mubr.msk.f32.mxu0 %vm3454_vm0, %v3455_v11 }
0x23bf   :  { %3324 = vmatprep.subr.bf16.mxu0 %v3453_v3 }
0x23c2   :  { %3326 = vmatpush3.bf16.msra.mxu0 %v3585_v33 }
0x248f   :  { %v2512_v55 = vpop.f32.mrb[30].mxu1  ;;  %v2582_v56 = vpop.f32.mrb[28].mxu0 }
0x2490   :  { %v3203_v57 = vpop.f32.mrb[31].mxu1  ;;  %v3208_v58 = vpop.f32.mrb[29].mxu0  ;;  %v2586_v59 = vsel %vm265_vm2, %v2582_v56, -inf  ;;  %v2743_v2 = vadd.f32 %v2512_v55, %v3599_v38 }
0x2491   :  { %2587 = vmax.xlane.f32.xlu0 %v2586_v59 }
0x251e   :  { %v2588_v15 = vpop.xlane.xlu0 %2587 }
0x251f   :  { %v2589_v61 = vsub.f32 %v2582_v56, %v2588_v15 }
0x2521   :  { %v2590_v62 = vmul.f32 1.442695, %v2589_v61 }
0x2523   :  { %3417 = vpow2.f32 %v2590_v62 }
0x252d   :  { %v3418_v63 = vpop.eup %3417 }
0x252e   :  { %3212 = vmatmul.mubr.msk.f32.vlgmr.msra.gmra.mrb[32].mxu1 %vm265_vm2, %v3418_v63  ;;  %v2592_v11 = vsel %vm265_vm2, %v3418_v63, 0.0 }
0x252f   :  { %2593 = vadd.xlane.f32.xlu1 %v2592_v11 }
0x25bc   :  { %v2594_v33 = vpop.xlane.xlu1 %2593 }
0x25bd   :  { %3419 = vrcp.f32 %v2594_v33 }
0x25c7   :  { %v3420_v0 = vpop.eup %3419 }
0x2601   :  { %v2666_v3 = vpop.f32.mrb[32].mxu1 }
0x2602   :  { %v3213_v31 = vpop.f32.mrb[33].mxu1  ;;  %3223 = vmatmul.mubr.msk.f32.vlgmr.msra.gmra.mrb[30].mxu0 %vm45_vm1, %v2666_v3 }
0x26d5   :  { %v2739_v1 = vpop.f32.mrb[30].mxu0 }
0x26d6   :  { %v2744_v5 = vmul.f32 %v3420_v0, %v2739_v1  ;;  %v3224_v6 = vpop.f32.mrb[31].mxu0 }
0x26d8   :  { %v2745_v7 = vadd.f32 %v2744_v5, %v2743_v2 }
0x26da   :  { %v2840_v8 = vmul.f32 -1.442695, %v2745_v7 }
0x26dc   :  { %3421 = vpow2.f32 %v2840_v8 }
0x26dd   :  { %3423 = vtanh.f32 %v2745_v7 }
0x26e6   :  { %v3422_v9 = vpop.eup %3421 }
0x26e7   :  { %v2749_v10 = vadd.f32 1.0, %v3422_v9  ;;  %v3424_v13 = vpop.eup %3423 }
0x26e9   :  { %3425 = vrcp.f32 %v2749_v10 }
0x26f3   :  { %v3426_v14 = vpop.eup %3425 }
0x26f4   :  { %v2753_v16 = vsel %vm121_vm3, %v3426_v14, %v3424_v13 }
0x26f5   :  { %2756 = vrot.lane.b32.xlu0 %v2753_v16, %s3456_s5  ;;  %v2754_v38 = vmul.f32 %v2753_v16, %v2433_v48 }
0x2767   :  { %v2757_v17 = vpop.permute.xlu0 %2756 }
0x2768   :  { %v2759_v18 = vmul.f32 %v2757_v17, %v2753_v16 }
0x276a   :  { %2761 = vrot.lane.b32.xlu1 %v2759_v18, %s3456_s5 }
0x27dc   :  { %v2762_v19 = vpop.permute.xlu1 %2761 }
0x27dd   :  { %v2764_v20 = vadd.f32 %v2762_v19, %v2754_v38 }
0x27df   :  { %3427 = vtanh.f32 %v2764_v20 }
0x27e9   :  { %v3428_v21 = vpop.eup %3427 }
0x27ea   :  { %2767 = vrot.lane.b32.xlu0 %v3428_v21, %s3456_s5 }
0x285c   :  { %v2768_v22 = vpop.permute.xlu0 %2767 }
0x285d   :  { %v2770_v23 = vmul.f32 %v2768_v22, %v2753_v16 }
0x285f   :  { %v2771_v24 = vadd.f32 %v2770_v23, %v3615_v60 }
0x2861   :  { %2773 = vrot.lane.b32.xlu1 %v2771_v24, %s3457_s22 }
0x28d3   :  { %v2774_v49 = vpop.permute.xlu1 %2773 }
0x28d4   :  { %2776 = vst.msk [vmem:[#allocation2] sm:$0xff] %vm45_vm1, %v2774_v49 }
0x28d5   :  { %3440 = shalt.err (!%p3437_p4)
}
0x28d6   :  { %s3441_s28 = scalar_lea.hbm %s3891_s6, 128 }
0x28d7   :  { %p3442_p5 = scmp.ne.s32.totalorder %s3891_s6, %s3441_s28  ;;  %p3445_p6 = scmp.lt.u32.totalorder %s3441_s28, %s3891_s6 }
0x28d9   :  { %p3447_p7 = pnand %p3445_p6, %p3442_p5 }
0x28db   :  { %3450 = shalt.err (!%p3447_p7)
}
0x28dc   :  { %2786 = dma.vmem_to_hbm [thread:$0]  %s2784_s24, 128, %s3891_s6, [#allocation3]  }
0x28dd   :  { %3451 = dma.done.wait [#allocation3], 128  }
0x28de   :  { %3452 = vsyncadd [#allocation3], 4294967168 }
0x28df   :  { %2790 = vsyncpa [#allocation3], 1 }

</bundles_post_ra>
